<compile_context>
chip_gen: v5e
topology: v5e:2x2
jax: 0.10.0
libtpu: 0.0.40
codegen_flags: <defaults>
</compile_context>

<pallas_src>
import functools

import jax
import jax.numpy as jnp
from jax.experimental import pallas as pl
from jax.experimental.pallas import tpu as pltpu

EPS = 1e-5  # PyTorch LayerNorm default


def _layernorm(x, gamma, beta):
    mu = jnp.mean(x, axis=-1, keepdims=True)
    var = jnp.mean((x - mu) ** 2, axis=-1, keepdims=True)
    return (x - mu) * jax.lax.rsqrt(var + EPS) * gamma + beta


def encoder_layer_kernel(x_ref, g1_ref, be1_ref, g2_ref, be2_ref,
                         wqkv_ref, bqkv_ref, wo_ref, bo_ref,
                         w1_ref, b1_ref, w2_ref, b2_ref,
                         o_ref, *, num_heads, scale):
    """One grid step = full encoder layer for a (block_b, S, E) batch tile."""
    blk_b, S, E = x_ref.shape
    H = num_heads
    Dh = E // H
    R = blk_b * S

    # ---- norm1 + fused QKV projection over all rows of the tile (one wide dot) ----
    x = x_ref[...].reshape(R, E)                                        # f32 rows
    xn = _layernorm(x, g1_ref[...], be1_ref[...]).astype(jnp.bfloat16)
    qkv = jnp.dot(xn, wqkv_ref[...],
                  preferred_element_type=jnp.float32) + bqkv_ref[...]   # (R, 3E) f32
    q = (qkv[:, 0:E] * scale).astype(jnp.bfloat16)   # 1/sqrt(Dh) folded into q
    k = qkv[:, E:2 * E].astype(jnp.bfloat16)
    v = qkv[:, 2 * E:3 * E].astype(jnp.bfloat16)

    # ---- attention: per-batch, per-head (statically unrolled), 2-D MXU dots only ----
    wo_all = wo_ref[...]                                                # (H, Dh, E) bf16
    attn_rows = []
    for b in range(blk_b):
        r0 = b * S
        attn = jnp.zeros((S, E), jnp.float32)
        for h in range(H):
            c0 = h * Dh
            q_h = q[r0:r0 + S, c0:c0 + Dh]                              # (S, Dh) bf16
            k_h = k[r0:r0 + S, c0:c0 + Dh]
            v_h = v[r0:r0 + S, c0:c0 + Dh]
            # scores = q_h @ k_h^T  (nt matmul, no explicit transpose materialized)
            s_h = jax.lax.dot_general(q_h, k_h, (((1,), (1,)), ((), ())),
                                      preferred_element_type=jnp.float32)  # (S, S)
            s_h = s_h - jnp.max(s_h, axis=-1, keepdims=True)
            p_h = jnp.exp(s_h)
            p_h = p_h * pl.reciprocal(jnp.sum(p_h, axis=-1, keepdims=True),
                                      approx=True)
            ctx_h = jnp.dot(p_h.astype(jnp.bfloat16), v_h,
                            preferred_element_type=jnp.float32)         # (S, Dh)
            # fold this head's slice of the output projection (no concat)
            attn = attn + jnp.dot(ctx_h.astype(jnp.bfloat16), wo_all[h],
                                  preferred_element_type=jnp.float32)   # (S, E)
        attn_rows.append(attn)
    attn2d = attn_rows[0] if blk_b == 1 else jnp.concatenate(attn_rows, axis=0)

    # ---- residual + norm2 + FFN (fused over all rows of the tile) ----
    x1 = x + attn2d + bo_ref[...]                                       # (R, E) f32
    xn2 = _layernorm(x1, g2_ref[...], be2_ref[...]).astype(jnp.bfloat16)
    h1 = jnp.dot(xn2, w1_ref[...], preferred_element_type=jnp.float32) + b1_ref[...]
    h1 = jnp.maximum(h1, 0.0).astype(jnp.bfloat16)                      # ReLU
    ff = jnp.dot(h1, w2_ref[...], preferred_element_type=jnp.float32) + b2_ref[...]
    # TODO(synk): for E < 128 (test shape E=32) o_ref stores are masked vst; pad E to a
    # multiple of 128 (with masked LayerNorm stats) if this ever becomes store-bound.
    o_ref[...] = (x1 + ff).reshape(blk_b, S, E)


def _pick_block_b(B, S):
    """Batch rows per grid step: amortize step overhead (target ~256 rows) while
    keeping >= 2 parallel grid steps (v7x has 2 TensorCores) and block_b | B."""
    best = 1
    for t in range(2, B + 1):
        if B % t == 0 and t * S <= 256 and B // t >= 2:
            best = t
    return best


def temporal_encoder_layer(src, params, *, num_heads):
    """src: (S, B, E) float32, PyTorch seq-first MultiheadAttention layout."""
    S, B, E = src.shape
    if E % num_heads != 0:
        raise ValueError("embed_dim must be divisible by num_heads")
    H = num_heads
    Dh = E // H
    (g1, be1, g2, be2, wqkv, bqkv, wo, bo, w1, b1, w2, b2) = params

    # Trace-time weight prep: fused qkv stays (E, 3E); out-proj split per head
    # (H, Dh, E) so the kernel can fold it head-by-head; matmul weights in bf16.
    bf16 = jnp.bfloat16
    wqkv_b = wqkv.astype(bf16)                 # (E, 3E)
    wo3 = wo.reshape(H, Dh, E).astype(bf16)    # (H, Dh, E)
    w1b = w1.astype(bf16)                      # (E, 4E)
    w2b = w2.astype(bf16)                      # (4E, E)

    # TODO(synk): the (S,B,E)<->(B,S,E) transposes stay in XLA; when stacking layers,
    # transpose once outside the stack (or accept batch-first) to avoid paying them
    # per layer.
    x = jnp.transpose(src, (1, 0, 2))          # (B, S, E)

    blk_b = _pick_block_b(B, S)
    grid = (B // blk_b,)

    per_b3 = lambda i: (i, 0, 0)               # activation tile, streamed per step
    res2 = lambda i: (0, 0)                    # resident weights / params
    res3 = lambda i: (0, 0, 0)

    in_specs = [
        pl.BlockSpec((blk_b, S, E), per_b3),   # x
        pl.BlockSpec((1, E), res2),            # norm1 gamma
        pl.BlockSpec((1, E), res2),            # norm1 beta
        pl.BlockSpec((1, E), res2),            # norm2 gamma
        pl.BlockSpec((1, E), res2),            # norm2 beta
        pl.BlockSpec((E, 3 * E), res2),        # fused qkv weight (bf16)
        pl.BlockSpec((1, 3 * E), res2),        # fused qkv bias
        pl.BlockSpec((H, Dh, E), res3),        # out-proj weight, per-head layout (bf16)
        pl.BlockSpec((1, E), res2),            # out-proj bias
        pl.BlockSpec((E, 4 * E), res2),        # linear1 weight (bf16)
        pl.BlockSpec((1, 4 * E), res2),        # linear1 bias
        pl.BlockSpec((4 * E, E), res2),        # linear2 weight (bf16)
        pl.BlockSpec((1, E), res2),            # linear2 bias
    ]
    out_spec = pl.BlockSpec((blk_b, S, E), per_b3)

    flops = B * (24 * S * E * E + 4 * S * S * E)
    transcendentals = B * H * S * S                    # softmax exps
    bytes_accessed = (8 * B * S * E                    # x in + out (f32)
                      + 2 * 12 * E * E                 # resident bf16 weights
                      + 4 * 12 * E)                    # biases / LN params

    # VMEM budget: resident weights (12*E^2 bf16) + double-buffered activation tiles;
    # cap at 48 MiB so the same tiling fits v7x's 64 MiB/TC as well as v5e/v6e's 128 MiB.
    resident_bytes = 2 * 12 * E * E
    tile_bytes = 4 * blk_b * S * E * 2 * 2             # x + out, double-buffered, f32
    vmem_limit = int(min(48 * 1024 * 1024,
                         max(16 * 1024 * 1024, 4 * (resident_bytes + tile_bytes))))

    kernel = functools.partial(encoder_layer_kernel,
                               num_heads=H, scale=1.0 / (Dh ** 0.5))
    out = pl.pallas_call(
        kernel,
        out_shape=jax.ShapeDtypeStruct((B, S, E), jnp.float32),
        grid=grid,
        in_specs=in_specs,
        out_specs=out_spec,
        compiler_params=pltpu.CompilerParams(
            dimension_semantics=("parallel",),
            vmem_limit_bytes=vmem_limit),
        cost_estimate=pl.CostEstimate(flops=flops,
                                      transcendentals=transcendentals,
                                      bytes_accessed=bytes_accessed),
    )(x, g1, be1, g2, be2, wqkv_b, bqkv, wo3, bo, w1b, b1, w2b, b2)
    return jnp.transpose(out, (1, 0, 2))  # back to (S, B, E)


def init_params(key, embed_dim):
    """Deterministic synthetic parameters matching TemporalEncoderLayer.__init__."""
    E = embed_dim
    ks = jax.random.split(key, 6)
    scale = 0.05
    g1 = jnp.ones((1, E), jnp.float32)
    be1 = jnp.zeros((1, E), jnp.float32)
    g2 = jnp.ones((1, E), jnp.float32)
    be2 = jnp.zeros((1, E), jnp.float32)
    # MultiheadAttention: in_proj (3E, E) and out_proj (E, E); stored transposed.
    wqkv = scale * jax.random.normal(ks[0], (E, 3 * E), jnp.float32)
    bqkv = scale * jax.random.normal(ks[1], (1, 3 * E), jnp.float32)
    wo = scale * jax.random.normal(ks[2], (E, E), jnp.float32)
    bo = jnp.zeros((1, E), jnp.float32)
    # FFN: linear1 (E -> 4E), linear2 (4E -> E); stored transposed.
    w1 = scale * jax.random.normal(ks[3], (E, 4 * E), jnp.float32)
    b1 = scale * jax.random.normal(ks[4], (1, 4 * E), jnp.float32)
    w2 = scale * jax.random.normal(ks[5], (4 * E, E), jnp.float32)
    b2 = jnp.zeros((1, E), jnp.float32)
    return (g1, be1, g2, be2, wqkv, bqkv, wo, bo, w1, b1, w2, b2)


def reference(src, params, *, num_heads):
    """Pure-JAX f32 reference matching PyTorch pre-norm encoder-layer semantics."""
    (g1, be1, g2, be2, wqkv, bqkv, wo, bo, w1, b1, w2, b2) = params
    x = jnp.transpose(src, (1, 0, 2))  # (B, S, E)
    B, S, E = x.shape
    Dh = E // num_heads
    scale = 1.0 / (Dh ** 0.5)

    xn = _layernorm(x, g1, be1)
    qkv = jnp.einsum('bse,ef->bsf', xn, wqkv) + bqkv
    q, k, v = qkv[..., :E], qkv[..., E:2 * E], qkv[..., 2 * E:]
    heads = []
    for h in range(num_heads):
        sl = slice(h * Dh, (h + 1) * Dh)
        s = jnp.einsum('bqd,bkd->bqk', q[..., sl], k[..., sl]) * scale
        p = jax.nn.softmax(s, axis=-1)
        heads.append(jnp.einsum('bqk,bkd->bqd', p, v[..., sl]))
    attn = jnp.concatenate(heads, axis=-1) @ wo + bo
    x = x + attn
    xn2 = _layernorm(x, g2, be2)
    ff = jnp.maximum(xn2 @ w1 + b1, 0.0) @ w2 + b2
    return jnp.transpose(x + ff, (1, 0, 2))


if __name__ == "__main__":
    S, B, E, H = 8, 2, 32, 8  # seq, batch, embed_dim, num_heads
    key = jax.random.PRNGKey(0)
    k_x, k_p = jax.random.split(key)
    src = jax.random.normal(k_x, (S, B, E), jnp.float32)
    params = init_params(k_p, E)

    out = jax.block_until_ready(temporal_encoder_layer(src, params, num_heads=H))
    ref = jax.block_until_ready(reference(src, params, num_heads=H))

    assert out.shape == (S, B, E)
    # bf16 MXU inputs (f32 accumulation) + approx reciprocal vs f32 reference.
    assert jnp.allclose(out, ref, rtol=2e-2, atol=2e-2), "mismatch vs JAX reference"

    print("KERNEL_OK")
</pallas_src>

<mosaic_0001>
module attributes {stable_mosaic.version = 11 : i64} {
  func.func @encoder_layer_kernel(%arg0: i32, %arg1: memref<1x8x32xf32, #tpu.memory_space<vmem>>, %arg2: memref<1x32xf32, #tpu.memory_space<vmem>>, %arg3: memref<1x32xf32, #tpu.memory_space<vmem>>, %arg4: memref<1x32xf32, #tpu.memory_space<vmem>>, %arg5: memref<1x32xf32, #tpu.memory_space<vmem>>, %arg6: memref<32x96xbf16, #tpu.memory_space<vmem>>, %arg7: memref<1x96xf32, #tpu.memory_space<vmem>>, %arg8: memref<8x4x32xbf16, #tpu.memory_space<vmem>>, %arg9: memref<1x32xf32, #tpu.memory_space<vmem>>, %arg10: memref<32x128xbf16, #tpu.memory_space<vmem>>, %arg11: memref<1x128xf32, #tpu.memory_space<vmem>>, %arg12: memref<128x32xbf16, #tpu.memory_space<vmem>>, %arg13: memref<1x32xf32, #tpu.memory_space<vmem>>, %arg14: memref<1x8x32xf32, #tpu.memory_space<vmem>>) attributes {dimension_semantics = [#tpu.dimension_semantics<parallel>], iteration_bounds = array<i64: 2>, scalar_prefetch = 0 : i64, scratch_operands = 0 : i64, tpu.core_type = #tpu.core_type<tc>, window_params = [{transform_indices = @transform_0, window_bounds = array<i64: 1, 8, 32>}, {pipeline_mode = #tpu.pipeline_mode<synchronous>, transform_indices = @transform_1, window_bounds = array<i64: 1, 32>}, {pipeline_mode = #tpu.pipeline_mode<synchronous>, transform_indices = @transform_2, window_bounds = array<i64: 1, 32>}, {pipeline_mode = #tpu.pipeline_mode<synchronous>, transform_indices = @transform_3, window_bounds = array<i64: 1, 32>}, {pipeline_mode = #tpu.pipeline_mode<synchronous>, transform_indices = @transform_4, window_bounds = array<i64: 1, 32>}, {pipeline_mode = #tpu.pipeline_mode<synchronous>, transform_indices = @transform_5, window_bounds = array<i64: 32, 96>}, {pipeline_mode = #tpu.pipeline_mode<synchronous>, transform_indices = @transform_6, window_bounds = array<i64: 1, 96>}, {pipeline_mode = #tpu.pipeline_mode<synchronous>, transform_indices = @transform_7, window_bounds = array<i64: 8, 4, 32>}, {pipeline_mode = #tpu.pipeline_mode<synchronous>, transform_indices = @transform_8, window_bounds = array<i64: 1, 32>}, {pipeline_mode = #tpu.pipeline_mode<synchronous>, transform_indices = @transform_9, window_bounds = array<i64: 32, 128>}, {pipeline_mode = #tpu.pipeline_mode<synchronous>, transform_indices = @transform_10, window_bounds = array<i64: 1, 128>}, {pipeline_mode = #tpu.pipeline_mode<synchronous>, transform_indices = @transform_11, window_bounds = array<i64: 128, 32>}, {pipeline_mode = #tpu.pipeline_mode<synchronous>, transform_indices = @transform_12, window_bounds = array<i64: 1, 32>}, {transform_indices = @transform_13, window_bounds = array<i64: 1, 8, 32>}]} {
    %c0 = arith.constant 0 : index
    %c0_0 = arith.constant 0 : index
    %c0_1 = arith.constant 0 : index
    %0 = vector.load %arg1[%c0, %c0_0, %c0_1] : memref<1x8x32xf32, #tpu.memory_space<vmem>>, vector<1x8x32xf32>
    %1 = vector.shape_cast %0 : vector<1x8x32xf32> to vector<8x32xf32>
    %c0_2 = arith.constant 0 : index
    %c0_3 = arith.constant 0 : index
    %2 = vector.load %arg2[%c0_2, %c0_3] : memref<1x32xf32, #tpu.memory_space<vmem>>, vector<1x32xf32>
    %c0_4 = arith.constant 0 : index
    %c0_5 = arith.constant 0 : index
    %3 = vector.load %arg3[%c0_4, %c0_5] : memref<1x32xf32, #tpu.memory_space<vmem>>, vector<1x32xf32>
    %cst = arith.constant dense<0.000000e+00> : vector<8xf32>
    %4 = vector.multi_reduction <add>, %1, %cst [1] : vector<8x32xf32> to vector<8xf32>
    %5 = vector.shape_cast %4 : vector<8xf32> to vector<8x1xf32>
    %cst_6 = arith.constant 3.200000e+01 : f32
    %6 = vector.broadcast %cst_6 : f32 to vector<8x1xf32>
    %7 = arith.divf %5, %6 : vector<8x1xf32>
    %8 = vector.broadcast %7 : vector<8x1xf32> to vector<8x32xf32>
    %9 = arith.subf %1, %8 : vector<8x32xf32>
    %10 = arith.mulf %9, %9 : vector<8x32xf32>
    %cst_7 = arith.constant dense<0.000000e+00> : vector<8xf32>
    %11 = vector.multi_reduction <add>, %10, %cst_7 [1] : vector<8x32xf32> to vector<8xf32>
    %12 = vector.shape_cast %11 : vector<8xf32> to vector<8x1xf32>
    %cst_8 = arith.constant 3.200000e+01 : f32
    %13 = vector.broadcast %cst_8 : f32 to vector<8x1xf32>
    %14 = arith.divf %12, %13 : vector<8x1xf32>
    %15 = vector.broadcast %7 : vector<8x1xf32> to vector<8x32xf32>
    %16 = arith.subf %1, %15 : vector<8x32xf32>
    %cst_9 = arith.constant 9.99999974E-6 : f32
    %17 = vector.broadcast %cst_9 : f32 to vector<8x1xf32>
    %18 = arith.addf %14, %17 : vector<8x1xf32>
    %19 = math.rsqrt %18 : vector<8x1xf32>
    %20 = vector.broadcast %19 : vector<8x1xf32> to vector<8x32xf32>
    %21 = arith.mulf %16, %20 : vector<8x32xf32>
    %22 = vector.broadcast %2 : vector<1x32xf32> to vector<8x32xf32>
    %23 = arith.mulf %21, %22 : vector<8x32xf32>
    %24 = vector.broadcast %3 : vector<1x32xf32> to vector<8x32xf32>
    %25 = arith.addf %23, %24 : vector<8x32xf32>
    %26 = arith.truncf %25 : vector<8x32xf32> to vector<8x32xbf16>
    %c0_10 = arith.constant 0 : index
    %c0_11 = arith.constant 0 : index
    %27 = vector.load %arg6[%c0_10, %c0_11] : memref<32x96xbf16, #tpu.memory_space<vmem>>, vector<32x96xbf16>
    %cst_12 = arith.constant dense<0.000000e+00> : vector<8x96xf32>
    %28 = tpu.matmul %26, %27, %cst_12 {dimension_numbers = #tpu.dot_dimension_numbers<[1], [0], [0], [1], [0, 0, 1, 1], [], []>} : vector<8x32xbf16>, vector<32x96xbf16>, vector<8x96xf32> -> vector<8x96xf32>
    %c0_13 = arith.constant 0 : index
    %c0_14 = arith.constant 0 : index
    %29 = vector.load %arg7[%c0_13, %c0_14] : memref<1x96xf32, #tpu.memory_space<vmem>>, vector<1x96xf32>
    %30 = vector.broadcast %29 : vector<1x96xf32> to vector<8x96xf32>
    %31 = arith.addf %28, %30 : vector<8x96xf32>
    %32 = vector.extract_strided_slice %31 {offsets = [0, 0], sizes = [8, 32], strides = [1, 1]} : vector<8x96xf32> to vector<8x32xf32>
    %cst_15 = arith.constant 5.000000e-01 : f32
    %33 = vector.broadcast %cst_15 : f32 to vector<8x32xf32>
    %34 = arith.mulf %32, %33 : vector<8x32xf32>
    %35 = arith.truncf %34 : vector<8x32xf32> to vector<8x32xbf16>
    %36 = vector.extract_strided_slice %31 {offsets = [0, 32], sizes = [8, 32], strides = [1, 1]} : vector<8x96xf32> to vector<8x32xf32>
    %37 = arith.truncf %36 : vector<8x32xf32> to vector<8x32xbf16>
    %38 = vector.extract_strided_slice %31 {offsets = [0, 64], sizes = [8, 32], strides = [1, 1]} : vector<8x96xf32> to vector<8x32xf32>
    %39 = arith.truncf %38 : vector<8x32xf32> to vector<8x32xbf16>
    %c0_16 = arith.constant 0 : index
    %c0_17 = arith.constant 0 : index
    %c0_18 = arith.constant 0 : index
    %40 = vector.load %arg8[%c0_16, %c0_17, %c0_18] : memref<8x4x32xbf16, #tpu.memory_space<vmem>>, vector<8x4x32xbf16>
    %cst_19 = arith.constant 0.000000e+00 : f32
    %41 = vector.broadcast %cst_19 : f32 to vector<8x32xf32>
    %42 = vector.extract_strided_slice %35 {offsets = [0, 0], sizes = [8, 4], strides = [1, 1]} : vector<8x32xbf16> to vector<8x4xbf16>
    %43 = vector.extract_strided_slice %37 {offsets = [0, 0], sizes = [8, 4], strides = [1, 1]} : vector<8x32xbf16> to vector<8x4xbf16>
    %44 = vector.extract_strided_slice %39 {offsets = [0, 0], sizes = [8, 4], strides = [1, 1]} : vector<8x32xbf16> to vector<8x4xbf16>
    %cst_20 = arith.constant dense<0.000000e+00> : vector<8x8xf32>
    %45 = tpu.matmul %42, %43, %cst_20 {dimension_numbers = #tpu.dot_dimension_numbers<[1], [1], [0], [0], [0, 0, 1, 0], [], []>} : vector<8x4xbf16>, vector<8x4xbf16>, vector<8x8xf32> -> vector<8x8xf32>
    %cst_21 = arith.constant dense<0xFF800000> : vector<8xf32>
    %46 = vector.multi_reduction <maximumf>, %45, %cst_21 [1] : vector<8x8xf32> to vector<8xf32>
    %47 = vector.shape_cast %46 : vector<8xf32> to vector<8x1xf32>
    %48 = vector.broadcast %47 : vector<8x1xf32> to vector<8x8xf32>
    %49 = arith.subf %45, %48 : vector<8x8xf32>
    %50 = math.exp %49 : vector<8x8xf32>
    %cst_22 = arith.constant dense<0.000000e+00> : vector<8xf32>
    %51 = vector.multi_reduction <add>, %50, %cst_22 [1] : vector<8x8xf32> to vector<8xf32>
    %52 = vector.shape_cast %51 : vector<8xf32> to vector<8x1xf32>
    %53 = tpu.reciprocal %52 {approx = true} : vector<8x1xf32> -> vector<8x1xf32>
    %54 = vector.broadcast %53 : vector<8x1xf32> to vector<8x8xf32>
    %55 = arith.mulf %50, %54 : vector<8x8xf32>
    %56 = arith.truncf %55 : vector<8x8xf32> to vector<8x8xbf16>
    %cst_23 = arith.constant dense<0.000000e+00> : vector<8x4xf32>
    %57 = tpu.matmul %56, %44, %cst_23 {dimension_numbers = #tpu.dot_dimension_numbers<[1], [0], [0], [1], [0, 0, 1, 1], [], []>} : vector<8x8xbf16>, vector<8x4xbf16>, vector<8x4xf32> -> vector<8x4xf32>
    %58 = arith.truncf %57 : vector<8x4xf32> to vector<8x4xbf16>
    %59 = vector.extract_strided_slice %40 {offsets = [0, 0, 0], sizes = [1, 4, 32], strides = [1, 1, 1]} : vector<8x4x32xbf16> to vector<1x4x32xbf16>
    %60 = vector.shape_cast %59 : vector<1x4x32xbf16> to vector<4x32xbf16>
    %cst_24 = arith.constant dense<0.000000e+00> : vector<8x32xf32>
    %61 = tpu.matmul %58, %60, %cst_24 {dimension_numbers = #tpu.dot_dimension_numbers<[1], [0], [0], [1], [0, 0, 1, 1], [], []>} : vector<8x4xbf16>, vector<4x32xbf16>, vector<8x32xf32> -> vector<8x32xf32>
    %62 = arith.addf %41, %61 : vector<8x32xf32>
    %63 = vector.extract_strided_slice %35 {offsets = [0, 4], sizes = [8, 4], strides = [1, 1]} : vector<8x32xbf16> to vector<8x4xbf16>
    %64 = vector.extract_strided_slice %37 {offsets = [0, 4], sizes = [8, 4], strides = [1, 1]} : vector<8x32xbf16> to vector<8x4xbf16>
    %65 = vector.extract_strided_slice %39 {offsets = [0, 4], sizes = [8, 4], strides = [1, 1]} : vector<8x32xbf16> to vector<8x4xbf16>
    %cst_25 = arith.constant dense<0.000000e+00> : vector<8x8xf32>
    %66 = tpu.matmul %63, %64, %cst_25 {dimension_numbers = #tpu.dot_dimension_numbers<[1], [1], [0], [0], [0, 0, 1, 0], [], []>} : vector<8x4xbf16>, vector<8x4xbf16>, vector<8x8xf32> -> vector<8x8xf32>
    %cst_26 = arith.constant dense<0xFF800000> : vector<8xf32>
    %67 = vector.multi_reduction <maximumf>, %66, %cst_26 [1] : vector<8x8xf32> to vector<8xf32>
    %68 = vector.shape_cast %67 : vector<8xf32> to vector<8x1xf32>
    %69 = vector.broadcast %68 : vector<8x1xf32> to vector<8x8xf32>
    %70 = arith.subf %66, %69 : vector<8x8xf32>
    %71 = math.exp %70 : vector<8x8xf32>
    %cst_27 = arith.constant dense<0.000000e+00> : vector<8xf32>
    %72 = vector.multi_reduction <add>, %71, %cst_27 [1] : vector<8x8xf32> to vector<8xf32>
    %73 = vector.shape_cast %72 : vector<8xf32> to vector<8x1xf32>
    %74 = tpu.reciprocal %73 {approx = true} : vector<8x1xf32> -> vector<8x1xf32>
    %75 = vector.broadcast %74 : vector<8x1xf32> to vector<8x8xf32>
    %76 = arith.mulf %71, %75 : vector<8x8xf32>
    %77 = arith.truncf %76 : vector<8x8xf32> to vector<8x8xbf16>
    %cst_28 = arith.constant dense<0.000000e+00> : vector<8x4xf32>
    %78 = tpu.matmul %77, %65, %cst_28 {dimension_numbers = #tpu.dot_dimension_numbers<[1], [0], [0], [1], [0, 0, 1, 1], [], []>} : vector<8x8xbf16>, vector<8x4xbf16>, vector<8x4xf32> -> vector<8x4xf32>
    %79 = arith.truncf %78 : vector<8x4xf32> to vector<8x4xbf16>
    %80 = vector.extract_strided_slice %40 {offsets = [1, 0, 0], sizes = [1, 4, 32], strides = [1, 1, 1]} : vector<8x4x32xbf16> to vector<1x4x32xbf16>
    %81 = vector.shape_cast %80 : vector<1x4x32xbf16> to vector<4x32xbf16>
    %cst_29 = arith.constant dense<0.000000e+00> : vector<8x32xf32>
    %82 = tpu.matmul %79, %81, %cst_29 {dimension_numbers = #tpu.dot_dimension_numbers<[1], [0], [0], [1], [0, 0, 1, 1], [], []>} : vector<8x4xbf16>, vector<4x32xbf16>, vector<8x32xf32> -> vector<8x32xf32>
    %83 = arith.addf %62, %82 : vector<8x32xf32>
    %84 = vector.extract_strided_slice %35 {offsets = [0, 8], sizes = [8, 4], strides = [1, 1]} : vector<8x32xbf16> to vector<8x4xbf16>
    %85 = vector.extract_strided_slice %37 {offsets = [0, 8], sizes = [8, 4], strides = [1, 1]} : vector<8x32xbf16> to vector<8x4xbf16>
    %86 = vector.extract_strided_slice %39 {offsets = [0, 8], sizes = [8, 4], strides = [1, 1]} : vector<8x32xbf16> to vector<8x4xbf16>
    %cst_30 = arith.constant dense<0.000000e+00> : vector<8x8xf32>
    %87 = tpu.matmul %84, %85, %cst_30 {dimension_numbers = #tpu.dot_dimension_numbers<[1], [1], [0], [0], [0, 0, 1, 0], [], []>} : vector<8x4xbf16>, vector<8x4xbf16>, vector<8x8xf32> -> vector<8x8xf32>
    %cst_31 = arith.constant dense<0xFF800000> : vector<8xf32>
    %88 = vector.multi_reduction <maximumf>, %87, %cst_31 [1] : vector<8x8xf32> to vector<8xf32>
    %89 = vector.shape_cast %88 : vector<8xf32> to vector<8x1xf32>
    %90 = vector.broadcast %89 : vector<8x1xf32> to vector<8x8xf32>
    %91 = arith.subf %87, %90 : vector<8x8xf32>
    %92 = math.exp %91 : vector<8x8xf32>
    %cst_32 = arith.constant dense<0.000000e+00> : vector<8xf32>
    %93 = vector.multi_reduction <add>, %92, %cst_32 [1] : vector<8x8xf32> to vector<8xf32>
    %94 = vector.shape_cast %93 : vector<8xf32> to vector<8x1xf32>
    %95 = tpu.reciprocal %94 {approx = true} : vector<8x1xf32> -> vector<8x1xf32>
    %96 = vector.broadcast %95 : vector<8x1xf32> to vector<8x8xf32>
    %97 = arith.mulf %92, %96 : vector<8x8xf32>
    %98 = arith.truncf %97 : vector<8x8xf32> to vector<8x8xbf16>
    %cst_33 = arith.constant dense<0.000000e+00> : vector<8x4xf32>
    %99 = tpu.matmul %98, %86, %cst_33 {dimension_numbers = #tpu.dot_dimension_numbers<[1], [0], [0], [1], [0, 0, 1, 1], [], []>} : vector<8x8xbf16>, vector<8x4xbf16>, vector<8x4xf32> -> vector<8x4xf32>
    %100 = arith.truncf %99 : vector<8x4xf32> to vector<8x4xbf16>
    %101 = vector.extract_strided_slice %40 {offsets = [2, 0, 0], sizes = [1, 4, 32], strides = [1, 1, 1]} : vector<8x4x32xbf16> to vector<1x4x32xbf16>
    %102 = vector.shape_cast %101 : vector<1x4x32xbf16> to vector<4x32xbf16>
    %cst_34 = arith.constant dense<0.000000e+00> : vector<8x32xf32>
    %103 = tpu.matmul %100, %102, %cst_34 {dimension_numbers = #tpu.dot_dimension_numbers<[1], [0], [0], [1], [0, 0, 1, 1], [], []>} : vector<8x4xbf16>, vector<4x32xbf16>, vector<8x32xf32> -> vector<8x32xf32>
    %104 = arith.addf %83, %103 : vector<8x32xf32>
    %105 = vector.extract_strided_slice %35 {offsets = [0, 12], sizes = [8, 4], strides = [1, 1]} : vector<8x32xbf16> to vector<8x4xbf16>
    %106 = vector.extract_strided_slice %37 {offsets = [0, 12], sizes = [8, 4], strides = [1, 1]} : vector<8x32xbf16> to vector<8x4xbf16>
    %107 = vector.extract_strided_slice %39 {offsets = [0, 12], sizes = [8, 4], strides = [1, 1]} : vector<8x32xbf16> to vector<8x4xbf16>
    %cst_35 = arith.constant dense<0.000000e+00> : vector<8x8xf32>
    %108 = tpu.matmul %105, %106, %cst_35 {dimension_numbers = #tpu.dot_dimension_numbers<[1], [1], [0], [0], [0, 0, 1, 0], [], []>} : vector<8x4xbf16>, vector<8x4xbf16>, vector<8x8xf32> -> vector<8x8xf32>
    %cst_36 = arith.constant dense<0xFF800000> : vector<8xf32>
    %109 = vector.multi_reduction <maximumf>, %108, %cst_36 [1] : vector<8x8xf32> to vector<8xf32>
    %110 = vector.shape_cast %109 : vector<8xf32> to vector<8x1xf32>
    %111 = vector.broadcast %110 : vector<8x1xf32> to vector<8x8xf32>
    %112 = arith.subf %108, %111 : vector<8x8xf32>
    %113 = math.exp %112 : vector<8x8xf32>
    %cst_37 = arith.constant dense<0.000000e+00> : vector<8xf32>
    %114 = vector.multi_reduction <add>, %113, %cst_37 [1] : vector<8x8xf32> to vector<8xf32>
    %115 = vector.shape_cast %114 : vector<8xf32> to vector<8x1xf32>
    %116 = tpu.reciprocal %115 {approx = true} : vector<8x1xf32> -> vector<8x1xf32>
    %117 = vector.broadcast %116 : vector<8x1xf32> to vector<8x8xf32>
    %118 = arith.mulf %113, %117 : vector<8x8xf32>
    %119 = arith.truncf %118 : vector<8x8xf32> to vector<8x8xbf16>
    %cst_38 = arith.constant dense<0.000000e+00> : vector<8x4xf32>
    %120 = tpu.matmul %119, %107, %cst_38 {dimension_numbers = #tpu.dot_dimension_numbers<[1], [0], [0], [1], [0, 0, 1, 1], [], []>} : vector<8x8xbf16>, vector<8x4xbf16>, vector<8x4xf32> -> vector<8x4xf32>
    %121 = arith.truncf %120 : vector<8x4xf32> to vector<8x4xbf16>
    %122 = vector.extract_strided_slice %40 {offsets = [3, 0, 0], sizes = [1, 4, 32], strides = [1, 1, 1]} : vector<8x4x32xbf16> to vector<1x4x32xbf16>
    %123 = vector.shape_cast %122 : vector<1x4x32xbf16> to vector<4x32xbf16>
    %cst_39 = arith.constant dense<0.000000e+00> : vector<8x32xf32>
    %124 = tpu.matmul %121, %123, %cst_39 {dimension_numbers = #tpu.dot_dimension_numbers<[1], [0], [0], [1], [0, 0, 1, 1], [], []>} : vector<8x4xbf16>, vector<4x32xbf16>, vector<8x32xf32> -> vector<8x32xf32>
    %125 = arith.addf %104, %124 : vector<8x32xf32>
    %126 = vector.extract_strided_slice %35 {offsets = [0, 16], sizes = [8, 4], strides = [1, 1]} : vector<8x32xbf16> to vector<8x4xbf16>
    %127 = vector.extract_strided_slice %37 {offsets = [0, 16], sizes = [8, 4], strides = [1, 1]} : vector<8x32xbf16> to vector<8x4xbf16>
    %128 = vector.extract_strided_slice %39 {offsets = [0, 16], sizes = [8, 4], strides = [1, 1]} : vector<8x32xbf16> to vector<8x4xbf16>
    %cst_40 = arith.constant dense<0.000000e+00> : vector<8x8xf32>
    %129 = tpu.matmul %126, %127, %cst_40 {dimension_numbers = #tpu.dot_dimension_numbers<[1], [1], [0], [0], [0, 0, 1, 0], [], []>} : vector<8x4xbf16>, vector<8x4xbf16>, vector<8x8xf32> -> vector<8x8xf32>
    %cst_41 = arith.constant dense<0xFF800000> : vector<8xf32>
    %130 = vector.multi_reduction <maximumf>, %129, %cst_41 [1] : vector<8x8xf32> to vector<8xf32>
    %131 = vector.shape_cast %130 : vector<8xf32> to vector<8x1xf32>
    %132 = vector.broadcast %131 : vector<8x1xf32> to vector<8x8xf32>
    %133 = arith.subf %129, %132 : vector<8x8xf32>
    %134 = math.exp %133 : vector<8x8xf32>
    %cst_42 = arith.constant dense<0.000000e+00> : vector<8xf32>
    %135 = vector.multi_reduction <add>, %134, %cst_42 [1] : vector<8x8xf32> to vector<8xf32>
    %136 = vector.shape_cast %135 : vector<8xf32> to vector<8x1xf32>
    %137 = tpu.reciprocal %136 {approx = true} : vector<8x1xf32> -> vector<8x1xf32>
    %138 = vector.broadcast %137 : vector<8x1xf32> to vector<8x8xf32>
    %139 = arith.mulf %134, %138 : vector<8x8xf32>
    %140 = arith.truncf %139 : vector<8x8xf32> to vector<8x8xbf16>
    %cst_43 = arith.constant dense<0.000000e+00> : vector<8x4xf32>
    %141 = tpu.matmul %140, %128, %cst_43 {dimension_numbers = #tpu.dot_dimension_numbers<[1], [0], [0], [1], [0, 0, 1, 1], [], []>} : vector<8x8xbf16>, vector<8x4xbf16>, vector<8x4xf32> -> vector<8x4xf32>
    %142 = arith.truncf %141 : vector<8x4xf32> to vector<8x4xbf16>
    %143 = vector.extract_strided_slice %40 {offsets = [4, 0, 0], sizes = [1, 4, 32], strides = [1, 1, 1]} : vector<8x4x32xbf16> to vector<1x4x32xbf16>
    %144 = vector.shape_cast %143 : vector<1x4x32xbf16> to vector<4x32xbf16>
    %cst_44 = arith.constant dense<0.000000e+00> : vector<8x32xf32>
    %145 = tpu.matmul %142, %144, %cst_44 {dimension_numbers = #tpu.dot_dimension_numbers<[1], [0], [0], [1], [0, 0, 1, 1], [], []>} : vector<8x4xbf16>, vector<4x32xbf16>, vector<8x32xf32> -> vector<8x32xf32>
    %146 = arith.addf %125, %145 : vector<8x32xf32>
    %147 = vector.extract_strided_slice %35 {offsets = [0, 20], sizes = [8, 4], strides = [1, 1]} : vector<8x32xbf16> to vector<8x4xbf16>
    %148 = vector.extract_strided_slice %37 {offsets = [0, 20], sizes = [8, 4], strides = [1, 1]} : vector<8x32xbf16> to vector<8x4xbf16>
    %149 = vector.extract_strided_slice %39 {offsets = [0, 20], sizes = [8, 4], strides = [1, 1]} : vector<8x32xbf16> to vector<8x4xbf16>
    %cst_45 = arith.constant dense<0.000000e+00> : vector<8x8xf32>
    %150 = tpu.matmul %147, %148, %cst_45 {dimension_numbers = #tpu.dot_dimension_numbers<[1], [1], [0], [0], [0, 0, 1, 0], [], []>} : vector<8x4xbf16>, vector<8x4xbf16>, vector<8x8xf32> -> vector<8x8xf32>
    %cst_46 = arith.constant dense<0xFF800000> : vector<8xf32>
    %151 = vector.multi_reduction <maximumf>, %150, %cst_46 [1] : vector<8x8xf32> to vector<8xf32>
    %152 = vector.shape_cast %151 : vector<8xf32> to vector<8x1xf32>
    %153 = vector.broadcast %152 : vector<8x1xf32> to vector<8x8xf32>
    %154 = arith.subf %150, %153 : vector<8x8xf32>
    %155 = math.exp %154 : vector<8x8xf32>
    %cst_47 = arith.constant dense<0.000000e+00> : vector<8xf32>
    %156 = vector.multi_reduction <add>, %155, %cst_47 [1] : vector<8x8xf32> to vector<8xf32>
    %157 = vector.shape_cast %156 : vector<8xf32> to vector<8x1xf32>
    %158 = tpu.reciprocal %157 {approx = true} : vector<8x1xf32> -> vector<8x1xf32>
    %159 = vector.broadcast %158 : vector<8x1xf32> to vector<8x8xf32>
    %160 = arith.mulf %155, %159 : vector<8x8xf32>
    %161 = arith.truncf %160 : vector<8x8xf32> to vector<8x8xbf16>
    %cst_48 = arith.constant dense<0.000000e+00> : vector<8x4xf32>
    %162 = tpu.matmul %161, %149, %cst_48 {dimension_numbers = #tpu.dot_dimension_numbers<[1], [0], [0], [1], [0, 0, 1, 1], [], []>} : vector<8x8xbf16>, vector<8x4xbf16>, vector<8x4xf32> -> vector<8x4xf32>
    %163 = arith.truncf %162 : vector<8x4xf32> to vector<8x4xbf16>
    %164 = vector.extract_strided_slice %40 {offsets = [5, 0, 0], sizes = [1, 4, 32], strides = [1, 1, 1]} : vector<8x4x32xbf16> to vector<1x4x32xbf16>
    %165 = vector.shape_cast %164 : vector<1x4x32xbf16> to vector<4x32xbf16>
    %cst_49 = arith.constant dense<0.000000e+00> : vector<8x32xf32>
    %166 = tpu.matmul %163, %165, %cst_49 {dimension_numbers = #tpu.dot_dimension_numbers<[1], [0], [0], [1], [0, 0, 1, 1], [], []>} : vector<8x4xbf16>, vector<4x32xbf16>, vector<8x32xf32> -> vector<8x32xf32>
    %167 = arith.addf %146, %166 : vector<8x32xf32>
    %168 = vector.extract_strided_slice %35 {offsets = [0, 24], sizes = [8, 4], strides = [1, 1]} : vector<8x32xbf16> to vector<8x4xbf16>
    %169 = vector.extract_strided_slice %37 {offsets = [0, 24], sizes = [8, 4], strides = [1, 1]} : vector<8x32xbf16> to vector<8x4xbf16>
    %170 = vector.extract_strided_slice %39 {offsets = [0, 24], sizes = [8, 4], strides = [1, 1]} : vector<8x32xbf16> to vector<8x4xbf16>
    %cst_50 = arith.constant dense<0.000000e+00> : vector<8x8xf32>
    %171 = tpu.matmul %168, %169, %cst_50 {dimension_numbers = #tpu.dot_dimension_numbers<[1], [1], [0], [0], [0, 0, 1, 0], [], []>} : vector<8x4xbf16>, vector<8x4xbf16>, vector<8x8xf32> -> vector<8x8xf32>
    %cst_51 = arith.constant dense<0xFF800000> : vector<8xf32>
    %172 = vector.multi_reduction <maximumf>, %171, %cst_51 [1] : vector<8x8xf32> to vector<8xf32>
    %173 = vector.shape_cast %172 : vector<8xf32> to vector<8x1xf32>
    %174 = vector.broadcast %173 : vector<8x1xf32> to vector<8x8xf32>
    %175 = arith.subf %171, %174 : vector<8x8xf32>
    %176 = math.exp %175 : vector<8x8xf32>
    %cst_52 = arith.constant dense<0.000000e+00> : vector<8xf32>
    %177 = vector.multi_reduction <add>, %176, %cst_52 [1] : vector<8x8xf32> to vector<8xf32>
    %178 = vector.shape_cast %177 : vector<8xf32> to vector<8x1xf32>
    %179 = tpu.reciprocal %178 {approx = true} : vector<8x1xf32> -> vector<8x1xf32>
    %180 = vector.broadcast %179 : vector<8x1xf32> to vector<8x8xf32>
    %181 = arith.mulf %176, %180 : vector<8x8xf32>
    %182 = arith.truncf %181 : vector<8x8xf32> to vector<8x8xbf16>
    %cst_53 = arith.constant dense<0.000000e+00> : vector<8x4xf32>
    %183 = tpu.matmul %182, %170, %cst_53 {dimension_numbers = #tpu.dot_dimension_numbers<[1], [0], [0], [1], [0, 0, 1, 1], [], []>} : vector<8x8xbf16>, vector<8x4xbf16>, vector<8x4xf32> -> vector<8x4xf32>
    %184 = arith.truncf %183 : vector<8x4xf32> to vector<8x4xbf16>
    %185 = vector.extract_strided_slice %40 {offsets = [6, 0, 0], sizes = [1, 4, 32], strides = [1, 1, 1]} : vector<8x4x32xbf16> to vector<1x4x32xbf16>
    %186 = vector.shape_cast %185 : vector<1x4x32xbf16> to vector<4x32xbf16>
    %cst_54 = arith.constant dense<0.000000e+00> : vector<8x32xf32>
    %187 = tpu.matmul %184, %186, %cst_54 {dimension_numbers = #tpu.dot_dimension_numbers<[1], [0], [0], [1], [0, 0, 1, 1], [], []>} : vector<8x4xbf16>, vector<4x32xbf16>, vector<8x32xf32> -> vector<8x32xf32>
    %188 = arith.addf %167, %187 : vector<8x32xf32>
    %189 = vector.extract_strided_slice %35 {offsets = [0, 28], sizes = [8, 4], strides = [1, 1]} : vector<8x32xbf16> to vector<8x4xbf16>
    %190 = vector.extract_strided_slice %37 {offsets = [0, 28], sizes = [8, 4], strides = [1, 1]} : vector<8x32xbf16> to vector<8x4xbf16>
    %191 = vector.extract_strided_slice %39 {offsets = [0, 28], sizes = [8, 4], strides = [1, 1]} : vector<8x32xbf16> to vector<8x4xbf16>
    %cst_55 = arith.constant dense<0.000000e+00> : vector<8x8xf32>
    %192 = tpu.matmul %189, %190, %cst_55 {dimension_numbers = #tpu.dot_dimension_numbers<[1], [1], [0], [0], [0, 0, 1, 0], [], []>} : vector<8x4xbf16>, vector<8x4xbf16>, vector<8x8xf32> -> vector<8x8xf32>
    %cst_56 = arith.constant dense<0xFF800000> : vector<8xf32>
    %193 = vector.multi_reduction <maximumf>, %192, %cst_56 [1] : vector<8x8xf32> to vector<8xf32>
    %194 = vector.shape_cast %193 : vector<8xf32> to vector<8x1xf32>
    %195 = vector.broadcast %194 : vector<8x1xf32> to vector<8x8xf32>
    %196 = arith.subf %192, %195 : vector<8x8xf32>
    %197 = math.exp %196 : vector<8x8xf32>
    %cst_57 = arith.constant dense<0.000000e+00> : vector<8xf32>
    %198 = vector.multi_reduction <add>, %197, %cst_57 [1] : vector<8x8xf32> to vector<8xf32>
    %199 = vector.shape_cast %198 : vector<8xf32> to vector<8x1xf32>
    %200 = tpu.reciprocal %199 {approx = true} : vector<8x1xf32> -> vector<8x1xf32>
    %201 = vector.broadcast %200 : vector<8x1xf32> to vector<8x8xf32>
    %202 = arith.mulf %197, %201 : vector<8x8xf32>
    %203 = arith.truncf %202 : vector<8x8xf32> to vector<8x8xbf16>
    %cst_58 = arith.constant dense<0.000000e+00> : vector<8x4xf32>
    %204 = tpu.matmul %203, %191, %cst_58 {dimension_numbers = #tpu.dot_dimension_numbers<[1], [0], [0], [1], [0, 0, 1, 1], [], []>} : vector<8x8xbf16>, vector<8x4xbf16>, vector<8x4xf32> -> vector<8x4xf32>
    %205 = arith.truncf %204 : vector<8x4xf32> to vector<8x4xbf16>
    %206 = vector.extract_strided_slice %40 {offsets = [7, 0, 0], sizes = [1, 4, 32], strides = [1, 1, 1]} : vector<8x4x32xbf16> to vector<1x4x32xbf16>
    %207 = vector.shape_cast %206 : vector<1x4x32xbf16> to vector<4x32xbf16>
    %cst_59 = arith.constant dense<0.000000e+00> : vector<8x32xf32>
    %208 = tpu.matmul %205, %207, %cst_59 {dimension_numbers = #tpu.dot_dimension_numbers<[1], [0], [0], [1], [0, 0, 1, 1], [], []>} : vector<8x4xbf16>, vector<4x32xbf16>, vector<8x32xf32> -> vector<8x32xf32>
    %209 = arith.addf %188, %208 : vector<8x32xf32>
    %210 = arith.addf %1, %209 : vector<8x32xf32>
    %c0_60 = arith.constant 0 : index
    %c0_61 = arith.constant 0 : index
    %211 = vector.load %arg9[%c0_60, %c0_61] : memref<1x32xf32, #tpu.memory_space<vmem>>, vector<1x32xf32>
    %212 = vector.broadcast %211 : vector<1x32xf32> to vector<8x32xf32>
    %213 = arith.addf %210, %212 : vector<8x32xf32>
    %c0_62 = arith.constant 0 : index
    %c0_63 = arith.constant 0 : index
    %214 = vector.load %arg4[%c0_62, %c0_63] : memref<1x32xf32, #tpu.memory_space<vmem>>, vector<1x32xf32>
    %c0_64 = arith.constant 0 : index
    %c0_65 = arith.constant 0 : index
    %215 = vector.load %arg5[%c0_64, %c0_65] : memref<1x32xf32, #tpu.memory_space<vmem>>, vector<1x32xf32>
    %cst_66 = arith.constant dense<0.000000e+00> : vector<8xf32>
    %216 = vector.multi_reduction <add>, %213, %cst_66 [1] : vector<8x32xf32> to vector<8xf32>
    %217 = vector.shape_cast %216 : vector<8xf32> to vector<8x1xf32>
    %cst_67 = arith.constant 3.200000e+01 : f32
    %218 = vector.broadcast %cst_67 : f32 to vector<8x1xf32>
    %219 = arith.divf %217, %218 : vector<8x1xf32>
    %220 = vector.broadcast %219 : vector<8x1xf32> to vector<8x32xf32>
    %221 = arith.subf %213, %220 : vector<8x32xf32>
    %222 = arith.mulf %221, %221 : vector<8x32xf32>
    %cst_68 = arith.constant dense<0.000000e+00> : vector<8xf32>
    %223 = vector.multi_reduction <add>, %222, %cst_68 [1] : vector<8x32xf32> to vector<8xf32>
    %224 = vector.shape_cast %223 : vector<8xf32> to vector<8x1xf32>
    %cst_69 = arith.constant 3.200000e+01 : f32
    %225 = vector.broadcast %cst_69 : f32 to vector<8x1xf32>
    %226 = arith.divf %224, %225 : vector<8x1xf32>
    %227 = vector.broadcast %219 : vector<8x1xf32> to vector<8x32xf32>
    %228 = arith.subf %213, %227 : vector<8x32xf32>
    %cst_70 = arith.constant 9.99999974E-6 : f32
    %229 = vector.broadcast %cst_70 : f32 to vector<8x1xf32>
    %230 = arith.addf %226, %229 : vector<8x1xf32>
    %231 = math.rsqrt %230 : vector<8x1xf32>
    %232 = vector.broadcast %231 : vector<8x1xf32> to vector<8x32xf32>
    %233 = arith.mulf %228, %232 : vector<8x32xf32>
    %234 = vector.broadcast %214 : vector<1x32xf32> to vector<8x32xf32>
    %235 = arith.mulf %233, %234 : vector<8x32xf32>
    %236 = vector.broadcast %215 : vector<1x32xf32> to vector<8x32xf32>
    %237 = arith.addf %235, %236 : vector<8x32xf32>
    %238 = arith.truncf %237 : vector<8x32xf32> to vector<8x32xbf16>
    %c0_71 = arith.constant 0 : index
    %c0_72 = arith.constant 0 : index
    %239 = vector.load %arg10[%c0_71, %c0_72] : memref<32x128xbf16, #tpu.memory_space<vmem>>, vector<32x128xbf16>
    %cst_73 = arith.constant dense<0.000000e+00> : vector<8x128xf32>
    %240 = tpu.matmul %238, %239, %cst_73 {dimension_numbers = #tpu.dot_dimension_numbers<[1], [0], [0], [1], [0, 0, 1, 1], [], []>} : vector<8x32xbf16>, vector<32x128xbf16>, vector<8x128xf32> -> vector<8x128xf32>
    %c0_74 = arith.constant 0 : index
    %c0_75 = arith.constant 0 : index
    %241 = vector.load %arg11[%c0_74, %c0_75] : memref<1x128xf32, #tpu.memory_space<vmem>>, vector<1x128xf32>
    %242 = vector.broadcast %241 : vector<1x128xf32> to vector<8x128xf32>
    %243 = arith.addf %240, %242 : vector<8x128xf32>
    %cst_76 = arith.constant 0.000000e+00 : f32
    %244 = vector.broadcast %cst_76 : f32 to vector<8x128xf32>
    %245 = arith.maximumf %243, %244 : vector<8x128xf32>
    %246 = arith.truncf %245 : vector<8x128xf32> to vector<8x128xbf16>
    %c0_77 = arith.constant 0 : index
    %c0_78 = arith.constant 0 : index
    %247 = vector.load %arg12[%c0_77, %c0_78] : memref<128x32xbf16, #tpu.memory_space<vmem>>, vector<128x32xbf16>
    %cst_79 = arith.constant dense<0.000000e+00> : vector<8x32xf32>
    %248 = tpu.matmul %246, %247, %cst_79 {dimension_numbers = #tpu.dot_dimension_numbers<[1], [0], [0], [1], [0, 0, 1, 1], [], []>} : vector<8x128xbf16>, vector<128x32xbf16>, vector<8x32xf32> -> vector<8x32xf32>
    %c0_80 = arith.constant 0 : index
    %c0_81 = arith.constant 0 : index
    %249 = vector.load %arg13[%c0_80, %c0_81] : memref<1x32xf32, #tpu.memory_space<vmem>>, vector<1x32xf32>
    %250 = vector.broadcast %249 : vector<1x32xf32> to vector<8x32xf32>
    %251 = arith.addf %248, %250 : vector<8x32xf32>
    %252 = arith.addf %213, %251 : vector<8x32xf32>
    %253 = vector.shape_cast %252 : vector<8x32xf32> to vector<1x8x32xf32>
    %c0_82 = arith.constant 0 : index
    %c0_83 = arith.constant 0 : index
    %c0_84 = arith.constant 0 : index
    %254 = vector.load %arg14[%c0_82, %c0_83, %c0_84] : memref<1x8x32xf32, #tpu.memory_space<vmem>>, vector<1x8x32xf32>
    tpu.vector_store %arg14[%c0_82, %c0_83, %c0_84], %253 {strides = array<i32>} : memref<1x8x32xf32, #tpu.memory_space<vmem>>, vector<1x8x32xf32>,
    return
  }
  func.func @transform_0(%arg0: i32) -> (i32, i32, i32) {
    %c0_i32 = arith.constant 0 : i32
    %c0_i32_0 = arith.constant 0 : i32
    %c0_i32_1 = arith.constant 0 : i32
    return %arg0, %c0_i32, %c0_i32_0 : i32, i32, i32
  }
  func.func @transform_1(%arg0: i32) -> (i32, i32) {
    %c0_i32 = arith.constant 0 : i32
    %c0_i32_0 = arith.constant 0 : i32
    %c0_i32_1 = arith.constant 0 : i32
    return %c0_i32, %c0_i32_0 : i32, i32
  }
  func.func @transform_2(%arg0: i32) -> (i32, i32) {
    %c0_i32 = arith.constant 0 : i32
    %c0_i32_0 = arith.constant 0 : i32
    %c0_i32_1 = arith.constant 0 : i32
    return %c0_i32, %c0_i32_0 : i32, i32
  }
  func.func @transform_3(%arg0: i32) -> (i32, i32) {
    %c0_i32 = arith.constant 0 : i32
    %c0_i32_0 = arith.constant 0 : i32
    %c0_i32_1 = arith.constant 0 : i32
    return %c0_i32, %c0_i32_0 : i32, i32
  }
  func.func @transform_4(%arg0: i32) -> (i32, i32) {
    %c0_i32 = arith.constant 0 : i32
    %c0_i32_0 = arith.constant 0 : i32
    %c0_i32_1 = arith.constant 0 : i32
    return %c0_i32, %c0_i32_0 : i32, i32
  }
  func.func @transform_5(%arg0: i32) -> (i32, i32) {
    %c0_i32 = arith.constant 0 : i32
    %c0_i32_0 = arith.constant 0 : i32
    %c0_i32_1 = arith.constant 0 : i32
    return %c0_i32, %c0_i32_0 : i32, i32
  }
  func.func @transform_6(%arg0: i32) -> (i32, i32) {
    %c0_i32 = arith.constant 0 : i32
    %c0_i32_0 = arith.constant 0 : i32
    %c0_i32_1 = arith.constant 0 : i32
    return %c0_i32, %c0_i32_0 : i32, i32
  }
  func.func @transform_7(%arg0: i32) -> (i32, i32, i32) {
    %c0_i32 = arith.constant 0 : i32
    %c0_i32_0 = arith.constant 0 : i32
    %c0_i32_1 = arith.constant 0 : i32
    %c0_i32_2 = arith.constant 0 : i32
    return %c0_i32, %c0_i32_0, %c0_i32_1 : i32, i32, i32
  }
  func.func @transform_8(%arg0: i32) -> (i32, i32) {
    %c0_i32 = arith.constant 0 : i32
    %c0_i32_0 = arith.constant 0 : i32
    %c0_i32_1 = arith.constant 0 : i32
    return %c0_i32, %c0_i32_0 : i32, i32
  }
  func.func @transform_9(%arg0: i32) -> (i32, i32) {
    %c0_i32 = arith.constant 0 : i32
    %c0_i32_0 = arith.constant 0 : i32
    %c0_i32_1 = arith.constant 0 : i32
    return %c0_i32, %c0_i32_0 : i32, i32
  }
  func.func @transform_10(%arg0: i32) -> (i32, i32) {
    %c0_i32 = arith.constant 0 : i32
    %c0_i32_0 = arith.constant 0 : i32
    %c0_i32_1 = arith.constant 0 : i32
    return %c0_i32, %c0_i32_0 : i32, i32
  }
  func.func @transform_11(%arg0: i32) -> (i32, i32) {
    %c0_i32 = arith.constant 0 : i32
    %c0_i32_0 = arith.constant 0 : i32
    %c0_i32_1 = arith.constant 0 : i32
    return %c0_i32, %c0_i32_0 : i32, i32
  }
  func.func @transform_12(%arg0: i32) -> (i32, i32) {
    %c0_i32 = arith.constant 0 : i32
    %c0_i32_0 = arith.constant 0 : i32
    %c0_i32_1 = arith.constant 0 : i32
    return %c0_i32, %c0_i32_0 : i32, i32
  }
  func.func @transform_13(%arg0: i32) -> (i32, i32, i32) {
    %c0_i32 = arith.constant 0 : i32
    %c0_i32_0 = arith.constant 0 : i32
    %c0_i32_1 = arith.constant 0 : i32
    return %arg0, %c0_i32, %c0_i32_0 : i32, i32, i32
  }
}

</mosaic_0001>

<bundles_post_ra>
// kernel: tpu_custom_call.1
= control target key start
LH: loop header
LB: loop body
LE: loop exit
PB: predicated region body
PF: predicated region fallthrough
CT: control target
= control target key end

     0   :  { %s2035_s0 = inlined_call_operand.vmem [shape: f32[2,8,32], index: 0, kind: input, shape index: {}]   ;;  %s2036_s1 = inlined_call_operand.vmem [shape: f32[1,32], index: 1, kind: input, shape index: {}]   ;;  %s2037_s2 = inlined_call_operand.vmem [shape: f32[1,32], index: 2, kind: input, shape index: {}]   ;;  %s2038_s3 = inlined_call_operand.vmem [shape: f32[1,32], index: 3, kind: input, shape index: {}]   ;;  %s2039_s4 = inlined_call_operand.vmem [shape: f32[1,32], index: 4, kind: input, shape index: {}]   ;;  %s2040_s5 = inlined_call_operand.vmem [shape: bf16[32,96], index: 5, kind: input, shape index: {}]   ;;  %s2041_s6 = inlined_call_operand.vmem [shape: f32[1,96], index: 6, kind: input, shape index: {}]   ;;  %s2042_s7 = inlined_call_operand.vmem [shape: bf16[8,4,32], index: 7, kind: input, shape index: {}]   ;;  %s2043_s8 = inlined_call_operand.vmem [shape: f32[1,32], index: 8, kind: input, shape index: {}]   ;;  %s2044_s9 = inlined_call_operand.vmem [shape: bf16[32,128], index: 9, kind: input, shape index: {}]   ;;  %s2045_s10 = inlined_call_operand.vmem [shape: f32[1,128], index: 10, kind: input, shape index: {}]   ;;  %s2046_s11 = inlined_call_operand.vmem [shape: bf16[128,32], index: 11, kind: input, shape index: {}]   ;;  %s2047_s12 = inlined_call_operand.vmem [shape: f32[1,32], index: 12, kind: input, shape index: {}]   ;;  %s2048_s13 = inlined_call_operand.hbm [shape: f32[2,8,32], index: 13, kind: output, shape index: {}]  }
   0x1   :  { %2049 = sst [smem:[#allocation5_spill]] %s2035_s0 }
   0x2   :  { %2050 = sst [smem:[#allocation6_spill]] %s2036_s1 }
   0x3   :  { %2051 = sst [smem:[#allocation7_spill]] %s2037_s2 }
   0x4   :  { %2052 = sst [smem:[#allocation8_spill]] %s2038_s3 }
   0x5   :  { %18 = vsyncpa [#allocation3], 0 }
   0x6   :  { %20 = vsyncpa [#allocation3 + $0x1], 0  ;;  %s1746_s25 = smov 0   ;;  %s1748_s26 = smov 0  }
   0x7   :  { %s1750_s27 = smov 0   ;;  %s1752_s28 = smov 0  }
   0x8 LB: > { %s1767_s29 = sadd.s32 4294967295, %s1650_s28   ;;  %s1383_s30 = sadd.s32 4294967294, %s1650_s28   ;;  %s1650_s28 = sphi %s1752_s28, %s2062_s28   ;;  %s1646_s27 = sphi %s1750_s27, %s2061_s27   ;;  %s1642_s26 = sphi %s1748_s26, %s2060_s26   ;;  %s1638_s25 = sphi %s1746_s25, %s2059_s25  }
   0x9   : > { %s1771_s14 = sadd.s32 1, %s1650_s28   ;;  %s311_s15 = sadd.s32 1, %s1646_s27 }
   0xa   : > { %s308_s16 = ssub.s32 %s1650_s28, %s1771_s14  ;;  %p321_p0 = scmp.ne.s32.totalorder %s1646_s27, %s1642_s26 }
   0xb   : > { %p309_p1 = scmp.eq.s32.totalorder %s308_s16, 0  ;;  %p322_p2 = scmp.eq.s32.totalorder %s1767_s29, 1 }
   0xc   : > { %p327_p3 = scmp.ne.s32.totalorder %s1642_s26, %s1638_s25  ;;  %p328_p4 = scmp.eq.s32.totalorder %s1383_s30, 1 }
   0xd   : > { %s1782_s17 = scalar_select %p309_p1, %s1646_s27, %s311_s15  }
   0xe   : > { %p1784_p5 = por %p322_p2, %p321_p0  ;;  %p1788_p6 = por %p328_p4, %p327_p3 }
   0xf   : > { %p1386_p7 = scmp.ge.s32.totalorder %s1650_s28, 1  ;;  %p389_p8 = scmp.lt.s32.totalorder %s1650_s28, 3 }
  0x11   : > { %p390_p9 = pnand %p1386_p7, %p389_p8 }
  0x12   : > { %p432_p10 = scmp.lt.s32.totalorder (!%p390_p9), %s1767_s29, 1  ;;  %s2055_s0 = sld [smem:[#allocation5_spill]] (!%p390_p9) }
  0x13   : > { %393 = sbr.rel (%p390_p9) target bundleno = 3366 (0xd26), region = 72  ;;  %s2056_s1 = sld [smem:[#allocation6_spill]] (!%p390_p9) }
  0x14   : > { %s2057_s2 = sld [smem:[#allocation7_spill]] (!%p390_p9)  ;;  %s1653_s16 = smov (!%p390_p9), 92  }
  0x15   : > { %s1656_s22 = smov (!%p390_p9), 120   ;;  %s1657_s23 = smov (!%p390_p9), 64  }
  0x16   : > { %s1659_s30 = smov (!%p390_p9), 84   ;;  %s1660_s15 = smov (!%p390_p9), 116  }
  0x17   : > { %s2058_s3 = sld [smem:[#allocation8_spill]] (!%p390_p9) }
  0x18   : > { %s433_s20 = scalar_select %p432_p10, %s1767_s29, 1  ;;  %vm440_vm0 = vcmask 261120   ;;  %v1652_v2 = vmov 32.0   ;;  %v1468_v14 = vld [vmem:[%s2040_s5 + $0x8] sm:$0xff]  ;;  %v1467_v15 = vld [vmem:[%s2040_s5] sm:$0xff]  ;;  %vm531_vm5 = vcmask 31744  }
  0x19   : > { %1550 = vrcp.f32 %v1652_v2  ;;  %508 = vmatpush.bf16.msra.mxu0 %v1468_v14  ;;  %v1542_v25 = vld [vmem:[%s2056_s1] ss:$0 sm:$0xff]  ;;  %vm551_vm6 = vcmask 64512   ;;  %vm650_vm7 = vcmask 1041408   ;;  %vm569_vm8 = vcmask 1043456  }
  0x1a   : > { %s1388_s21 = sshll.u32 %s433_s20, 3  ;;  %v1543_v28 = vld [vmem:[%s2057_s2] ss:$0 sm:$0xff]  ;;  %s1654_s20 = smov 96  }
  0x1b   : > { %s435_s24 = scalar_lea.vmem %s2055_s0, %s1388_s21  ;;  %v1544_v32 = vld [vmem:[%s2041_s6] ss:$0 sm:$0xff]  ;;  %s1655_s21 = smov 88  }
  0x1c   : > { %v1799_v0 = vld [vmem:[%s435_s24] sm:$0xff]  ;;  %s1658_s24 = smov 124  }
  0x1d   : > { %v441_v1 = vsel %vm440_vm0, %v1799_v0, 0.0  ;;  %509 = vmatpush.bf16.msra.mxu0 %v1467_v15  ;;  %v518_v57 = vld [vmem:[%s2042_s7] sm:$0x3] }
  0x1e   : > { %442 = vadd.xlane.f32.xlu0 %v441_v1  ;;  %v671_v58 = vsel %vm650_vm7, %v518_v57, 0  ;;  %v519_v57 = vld [vmem:[%s2042_s7 + $0x2] sm:$0x3] }
  0x1f   : > { %v1551_v3 = vpop.eup %1550  ;;  %680 = vmatpush.bf16.msra.mxu1 %v671_v58  ;;  %v652_v58 = vsel %vm650_vm7, %v519_v57, 0 }
  0x20   : > { %v445_v4 = vmul.f32 32.0, %v1551_v3  ;;  %vm449_vm1 = vweird.f32 %v1551_v3 }
  0x21   : > { %661 = vmatpush.bf16.msrb.mxu0 %v652_v58 }
  0x22   : > { %v446_v5 = vsub.f32 1.0, %v445_v4 }
  0x24   : > { %v447_v6 = vmul.f32 %v1551_v3, %v446_v5 }
  0x26   : > { %v448_v7 = vadd.f32 %v1551_v3, %v447_v6 }
  0x28   : > { %v1803_v8 = vsel %vm449_vm1, %v1551_v3, %v448_v7 }
  0x91   : > { %v443_v9 = vpop.xlane.xlu0 %442 }
  0x92   : > { %v451_v10 = vmul.f32 %v1803_v8, %v443_v9 }
  0x94   : > { %v452_v11 = vsub.f32 %v1799_v0, %v451_v10 }
  0x96   : > { %v453_v12 = vmul.f32 %v452_v11, %v452_v11 }
  0x98   : > { %v454_v13 = vsel %vm440_vm0, %v453_v12, 0.0 }
  0x99   : > { %455 = vadd.xlane.f32.xlu0 %v454_v13 }
 0x10c   : > { %v456_v16 = vpop.xlane.xlu0 %455 }
 0x10d   : > { %v457_v17 = vmul.f32 %v456_v16, %v1803_v8 }
 0x10f   : > { %v458_v18 = vadd.f32 1e-05, %v457_v17 }
 0x111   : > { %1552 = vrsqrt.f32 %v458_v18  ;;  %vm465_vm3 = vweird.f32 %v458_v18 }
 0x117   : > { %v1553_v19 = vpop.eup %1552 }
 0x118   : > { %v460_v20 = vmul.f32 %v1553_v19, %v458_v18  ;;  %vm466_vm2 = vweird.f32 %v1553_v19 }
 0x119   : > { %vm467_vm4 = vmor %vm465_vm3, %vm466_vm2 }
 0x11a   : > { %v461_v21 = vmul.f32 %v1553_v19, %v460_v20 }
 0x11c   : > { %v462_v22 = vmul.f32 0.5, %v461_v21 }
 0x11e   : > { %v463_v23 = vsub.f32 1.5, %v462_v22 }
 0x120   : > { %v464_v24 = vmul.f32 %v1553_v19, %v463_v23 }
 0x122   : > { %v468_v26 = vsel %vm467_vm4, %v1553_v19, %v464_v24 }
 0x123   : > { %v469_v27 = vmul.f32 %v468_v26, %v452_v11 }
 0x125   : > { %v473_v29 = vmul.f32 %v1542_v25, %v469_v27 }
 0x127   : > { %v477_v30 = vadd.f32 %v1543_v28, %v473_v29 }
 0x129   : > { %v478_v31 = vpack.c.bf16 %v477_v30, %v477_v30 }
 0x12b   : > { %1397 = vmatmul.msk.bf16.vlgmr.msra.gmra.mxu0 %vm440_vm0, %v478_v31 }
 0x1a8   : > { %v511_v33 = vpop.f32.mrf.mxu0 }
 0x1a9   : > { %v512_v34 = vadd.f32 %v1544_v32, %v511_v33 }
 0x1ab   : > { %v517_v35 = vpack.c.bf16 %v512_v34, %v512_v34  ;;  %v515_v39 = vmul.f32 0.5, %v512_v34 }
 0x1ad   : > { %v527_v36 = vunpack.c.l.b16 %v517_v35  ;;  %v516_v40 = vpack.c.bf16 %v515_v39, %v515_v39 }
 0x1af   : > { %v1825_v37 = vpack.c.b16 %v527_v36, %v527_v36  ;;  %v588_v41 = vunpack.c.l.b16 %v516_v40 }
 0x1b0   : > { %v513_v38 = vpop.f32.mrf.mxu0 }
 0x1b1   : > { %592 = vrot.lane.b32.xlu0 %v1825_v37, %s1653_s16  ;;  %529 = vrot.lane.b32.xlu1 %v1825_v37, %s1654_s20  ;;  %v1830_v42 = vpack.c.b16 %v588_v41, %v588_v41  ;;  %s1667_s16 = smov 112   ;;  %s1670_s20 = smov 68  }
 0x1b9   : > { %688 = vrot.lane.b32.xlu0 %v1825_v37, %s1655_s21  ;;  %s1661_s21 = smov 52  }
 0x1c1   : > { %686 = vrot.lane.b32.xlu0 %v1830_v42, %s1656_s22  ;;  %s1662_s22 = smov 76  }
 0x223   : > { %v593_v43 = vpop.permute.xlu0 %592  ;;  %v530_v44 = vpop.permute.xlu1 %529 }
 0x224   : > { %v536_v45 = vsel %vm531_vm5, %v530_v44, 0  ;;  %v598_v46 = vsel %vm531_vm5, %v593_v43, 0 }
 0x225   : > { %545 = vmatpush.bf16.xpose.msra.mxu3 %v536_v45 }
 0x22b   : > { %v689_v47 = vpop.permute.xlu0 %688 }
 0x22c   : > { %v694_v48 = vsel %vm531_vm5, %v689_v47, 0  ;;  %1398 = vmatmul.msk.bf16.vlgmr.msra.gmra.mxu3 %vm531_vm5, %v516_v40 }
 0x22d   : > { %607 = vmatpush.bf16.xpose.msrb.mxu3 %v598_v46 }
 0x233   : > { %v687_v5 = vpop.permute.xlu0 %686 }
 0x235   : > { %703 = vmatpush.bf16.xpose.msra.mxu3 %v694_v48 }
 0x2af   : > { %v547_v49 = vpop.f32.mrf.mxu3 }
 0x2b0   : > { %v552_v50 = vsel %vm551_vm6, %v547_v49, -inf }
 0x2b1   : > { %553 = vmax.xlane.f32.xlu1 %v552_v50 }
 0x2b7   : > { %v549_v51 = vpop.f32.mrf.mxu3 }
 0x324   : > { %v554_v52 = vpop.xlane.xlu1 %553 }
 0x325   : > { %v555_v53 = vsub.f32 %v547_v49, %v554_v52  ;;  %v521_v49 = vld [vmem:[%s2042_s7 + $0x6] sm:$0x3] }
 0x326   : > { %v824_v52 = vsel %vm650_vm7, %v521_v49, 0 }
 0x327   : > { %v556_v54 = vmul.f32 1.442695, %v555_v53 }
 0x329   : > { %1554 = vpow2.f32 %v556_v54 }
 0x32f   : > { %v1555_v55 = vpop.eup %1554 }
 0x330   : > { %v558_v56 = vsel %vm551_vm6, %v1555_v55, 0.0 }
 0x331   : > { %559 = vadd.xlane.f32.xlu2 %v558_v56 }
 0x349   : > { %564 = vrot.lane.b32.xlu2 %v1825_v37, %s1657_s23  ;;  %s1663_s23 = smov 108  }
 0x351   : > { %590 = vrot.lane.b32.xlu2 %v1830_v42, %s1658_s24  ;;  %s1664_s24 = smov 60  }
 0x359   : > { %765 = vrot.lane.b32.xlu2 %v1825_v37, %s1659_s30  ;;  %s1665_s30 = smov 56  }
 0x361   : > { %763 = vrot.lane.b32.xlu2 %v1830_v42, %s1660_s15  ;;  %s1666_s15 = smov 80  }
 0x3a4   : > { %v560_v59 = vpop.xlane.xlu2 %559 }
 0x3a5   : > { %1556 = vrcp.f32 %v560_v59  ;;  %v520_v59 = vld [vmem:[%s2042_s7 + $0x4] sm:$0x3] }
 0x3ab   : > { %v1557_v60 = vpop.eup %1556 }
 0x3ac   : > { %v565_v61 = vpop.permute.xlu2 %564  ;;  %v562_v62 = vmul.f32 %v1557_v60, %v1555_v55  ;;  %v747_v60 = vsel %vm650_vm7, %v520_v59, 0 }
 0x3ad   : > { %v571_v63 = vsel %vm569_vm8, %v565_v61, 0  ;;  %756 = vmatpush.bf16.msra.mxu0 %v747_v60 }
 0x3ae   : > { %580 = vmatpush.bf16.msra.mxu2 %v571_v63  ;;  %v563_v1 = vpack.c.bf16 %v562_v62, %v562_v62 }
 0x3b1   : > { %1399 = vmatmul.msk.bf16.vlgmr.msra.gmra.mxu2 %vm551_vm6, %v563_v1 }
 0x3b4   : > { %v591_v2 = vpop.permute.xlu2 %590 }
 0x3b5   : > { %1400 = vmatmul.msk.bf16.vlgmr.msrb.gmra.mxu3 %vm531_vm5, %v591_v2 }
 0x3bc   : > { %v766_v3 = vpop.permute.xlu2 %765 }
 0x3bd   : > { %v771_v4 = vsel %vm531_vm5, %v766_v3, 0 }
 0x3be   : > { %780 = vmatpush.bf16.xpose.msrb.mxu1 %v771_v4 }
 0x3c4   : > { %v764_v13 = vpop.permute.xlu2 %763 }
 0x3c5   : > { %1404 = vmatmul.msk.bf16.vlgmr.msra.gmra.mxu3 %vm531_vm5, %v687_v5 }
 0x434   : > { %v582_v6 = vpop.f32.mrf.mxu2 }
 0x435   : > { %v586_v7 = vpack.c.bf16 %v582_v6, %v582_v6 }
 0x437   : > { %1403 = vmatmul.msk.bf16.vlgmr.msra.gmra.mxu1 %vm531_vm5, %v586_v7 }
 0x438   : > { %v609_v9 = vpop.f32.mrf.mxu3 }
 0x439   : > { %v613_v10 = vsel %vm551_vm6, %v609_v9, -inf }
 0x43a   : > { %614 = vmax.xlane.f32.xlu1 %v613_v10 }
 0x43c   : > { %v584_v11 = vpop.f32.mrf.mxu2 }
 0x440   : > { %v611_v12 = vpop.f32.mrf.mxu3 }
 0x447   : > { %1407 = vmatmul.msk.bf16.vlgmr.msrb.gmra.mxu1 %vm531_vm5, %v764_v13 }
 0x448   : > { %v705_v14 = vpop.f32.mrf.mxu3 }
 0x449   : > { %v709_v15 = vsel %vm551_vm6, %v705_v14, -inf }
 0x44a   : > { %710 = vmax.xlane.f32.xlu2 %v709_v15 }
 0x450   : > { %v707_v16 = vpop.f32.mrf.mxu3 }
 0x462   : > { %798 = vrot.lane.b32.xlu2 %v1825_v37, %s1661_s21  ;;  %s1675_s21 = smov 40  }
 0x46a   : > { %919 = vrot.lane.b32.xlu2 %v1825_v37, %s1662_s22  ;;  %s429_s22 = sand.u32 1, %s1642_s26  }
 0x472   : > { %917 = vrot.lane.b32.xlu2 %v1830_v42, %s1663_s23  ;;  %s1387_s23 = sshll.u32 %s429_s22, 3 }
 0x4ad   : > { %v615_v17 = vpop.xlane.xlu1 %614 }
 0x4ae   : > { %v616_v18 = vsub.f32 %v609_v9, %v615_v17 }
 0x4b0   : > { %v617_v19 = vmul.f32 1.442695, %v616_v18 }
 0x4b2   : > { %1558 = vpow2.f32 %v617_v19 }
 0x4b4   : > { %v1859_v20 = vpop.f32.mrf.mxu1 }
 0x4b8   : > { %v1559_v21 = vpop.eup %1558 }
 0x4b9   : > { %v619_v22 = vsel %vm551_vm6, %v1559_v21, 0.0 }
 0x4ba   : > { %620 = vadd.xlane.f32.xlu1 %v619_v22 }
 0x4bc   : > { %v684_v23 = vpop.f32.mrf.mxu1 }
 0x4bd   : > { %v711_v24 = vpop.xlane.xlu2 %710 }
 0x4be   : > { %v712_v25 = vsub.f32 %v705_v14, %v711_v24 }
 0x4c0   : > { %v713_v26 = vmul.f32 1.442695, %v712_v25 }
 0x4c2   : > { %1560 = vpow2.f32 %v713_v26 }
 0x4c4   : > { %v782_v27 = vpop.f32.mrf.mxu1 }
 0x4c5   : > { %v799_v28 = vpop.permute.xlu2 %798  ;;  %v786_v29 = vsel %vm551_vm6, %v782_v27, -inf }
 0x4c6   : > { %v804_v30 = vsel %vm569_vm8, %v799_v28, 0  ;;  %787 = vmax.xlane.f32.xlu0 %v786_v29 }
 0x4c7   : > { %813 = vmatpush.bf16.msrb.mxu3 %v804_v30 }
 0x4c8   : > { %v1561_v31 = vpop.eup %1560 }
 0x4c9   : > { %v715_v33 = vsel %vm551_vm6, %v1561_v31, 0.0 }
 0x4cc   : > { %v784_v32 = vpop.f32.mrf.mxu1 }
 0x4cd   : > { %v920_v54 = vpop.permute.xlu2 %919 }
 0x4ce   : > { %716 = vadd.xlane.f32.xlu0 %v715_v33  ;;  %v925_v56 = vsel %vm531_vm5, %v920_v54, 0 }
 0x4d3   : > { %625 = vrot.lane.b32.xlu1 %v1825_v37, %s1664_s24  ;;  %s1464_s24 = sshll.u32 %s1767_s29, 3  ;;  %s1309_s29 = scalar_lea.sflag [#allocation3], %s429_s22 }
 0x4d4   : > { %s1319_s1 = scalar_lea.hbm %s2048_s13, %s1464_s24 }
 0x4d5   : > { %v918_v17 = vpop.permute.xlu2 %917  ;;  %s1323_s2 = sshll.u32 %s1319_s1, 4  ;;  %s1324_s2 = int_to_ptr.hbm [resolvable:$true] %s1323_s2 }
 0x4e2   : > { %721 = vrot.lane.b32.xlu0 %v1825_v37, %s1665_s30  ;;  %s1671_s30 = smov 44  }
 0x4ea   : > { %842 = vrot.lane.b32.xlu0 %v1825_v37, %s1666_s15  ;;  %s1668_s15 = smov 48  }
 0x4f2   : > { %840 = vrot.lane.b32.xlu0 %v1830_v42, %s1667_s16  ;;  %s1669_s16 = smov 72  }
 0x52d   : > { %v621_v34 = vpop.xlane.xlu1 %620 }
 0x52e   : > { %1562 = vrcp.f32 %v621_v34 }
 0x534   : > { %v1563_v39 = vpop.eup %1562 }
 0x535   : > { %v623_v41 = vmul.f32 %v1563_v39, %v1559_v21  ;;  %v522_v39 = vld [vmem:[%s2042_s7 + $0x8] sm:$0x3] }
 0x537   : > { %v624_v47 = vpack.c.bf16 %v623_v41, %v623_v41 }
 0x539   : > { %v788_v35 = vpop.xlane.xlu0 %787 }
 0x53a   : > { %v789_v36 = vsub.f32 %v782_v27, %v788_v35 }
 0x53c   : > { %v790_v38 = vmul.f32 1.442695, %v789_v36 }
 0x53e   : > { %1564 = vpow2.f32 %v790_v38 }
 0x541   : > { %v717_v46 = vpop.xlane.xlu0 %716 }
 0x542   : > { %1566 = vrcp.f32 %v717_v46 }
 0x544   : > { %v1565_v40 = vpop.eup %1564 }
 0x545   : > { %v626_v43 = vpop.permute.xlu1 %625  ;;  %v792_v44 = vsel %vm551_vm6, %v1565_v40, 0.0 }
 0x546   : > { %793 = vadd.xlane.f32.xlu1 %v792_v44  ;;  %v631_v45 = vsel %vm569_vm8, %v626_v43, 0  ;;  %v523_v44 = vld [vmem:[%s2042_s7 + $0xa] sm:$0x3] }
 0x547   : > { %640 = vmatpush.bf16.msrb.mxu2 %v631_v45  ;;  %v978_v46 = vsel %vm650_vm7, %v523_v44, 0 }
 0x548   : > { %v1567_v48 = vpop.eup %1566 }
 0x549   : > { %v719_v50 = vmul.f32 %v1567_v48, %v1561_v31 }
 0x54a   : > { %1401 = vmatmul.msk.bf16.vlgmr.msrb.gmra.mxu2 %vm551_vm6, %v624_v47 }
 0x54b   : > { %v720_v55 = vpack.c.bf16 %v719_v50, %v719_v50 }
 0x554   : > { %v722_v51 = vpop.permute.xlu0 %721 }
 0x555   : > { %v727_v53 = vsel %vm569_vm8, %v722_v51, 0 }
 0x556   : > { %736 = vmatpush.bf16.msra.mxu2 %v727_v53 }
 0x55a   : > { %833 = vmatpush.bf16.msrb.mxu2 %v824_v52 }
 0x55b   : > { %1405 = vmatmul.msk.bf16.vlgmr.msra.gmra.mxu2 %vm551_vm6, %v720_v55 }
 0x55c   : > { %v843_v2 = vpop.permute.xlu0 %842 }
 0x55d   : > { %v848_v5 = vsel %vm531_vm5, %v843_v2, 0 }
 0x55e   : > { %934 = vmatpush.bf16.xpose.msra.mxu2 %v925_v56 }
 0x564   : > { %v841_v11 = vpop.permute.xlu0 %840 }
 0x5b9   : > { %v794_v61 = vpop.xlane.xlu1 %793 }
 0x5ba   : > { %1568 = vrcp.f32 %v794_v61 }
 0x5c0   : > { %v1569_v62 = vpop.eup %1568 }
 0x5c1   : > { %v796_v63 = vmul.f32 %v1569_v62, %v1565_v40  ;;  %v901_v40 = vsel %vm650_vm7, %v522_v39, 0 }
 0x5c2   : > { %910 = vmatpush.bf16.msra.mxu3 %v901_v40 }
 0x5c3   : > { %v797_v1 = vpack.c.bf16 %v796_v63, %v796_v63 }
 0x5c5   : > { %1408 = vmatmul.msk.bf16.vlgmr.msrb.gmra.mxu3 %vm551_vm6, %v797_v1 }
 0x5cd   : > { %v642_v3 = vpop.f32.mrf.mxu2 }
 0x5ce   : > { %v646_v4 = vpack.c.bf16 %v642_v3, %v642_v3 }
 0x5d0   : > { %1402 = vmatmul.msk.bf16.vlgmr.msrb.gmra.mxu0 %vm531_vm5, %v646_v4 }
 0x5d1   : > { %857 = vmatpush.bf16.xpose.msrb.mxu0 %v848_v5 }
 0x5d5   : > { %v644_v6 = vpop.f32.mrf.mxu2 }
 0x5de   : > { %v738_v7 = vpop.f32.mrf.mxu2 }
 0x5df   : > { %v742_v9 = vpack.c.bf16 %v738_v7, %v738_v7 }
 0x5e1   : > { %1406 = vmatmul.msk.bf16.vlgmr.msra.gmra.mxu0 %vm531_vm5, %v742_v9 }
 0x5e6   : > { %v740_v10 = vpop.f32.mrf.mxu2 }
 0x5f1   : > { %1410 = vmatmul.msk.bf16.vlgmr.msrb.gmra.mxu0 %vm531_vm5, %v841_v11 }
 0x648   : > { %v815_v12 = vpop.f32.mrf.mxu3 }
 0x649   : > { %v819_v13 = vpack.c.bf16 %v815_v12, %v815_v12 }
 0x64b   : > { %1409 = vmatmul.msk.bf16.vlgmr.msrb.gmra.mxu2 %vm531_vm5, %v819_v13 }
 0x64d   : > { %v663_v14 = vpop.f32.mrf.mxu0 }
 0x64e   : > { %v683_v18 = vadd.f32 %v1859_v20, %v663_v14 }
 0x650   : > { %v817_v15 = vpop.f32.mrf.mxu3 }
 0x655   : > { %v665_v16 = vpop.f32.mrf.mxu0 }
 0x65b   : > { %1413 = vmatmul.msk.bf16.vlgmr.msra.gmra.mxu2 %vm531_vm5, %v918_v17 }
 0x65e   : > { %v758_v19 = vpop.f32.mrf.mxu0 }
 0x65f   : > { %v762_v21 = vadd.f32 %v758_v19, %v683_v18 }
 0x666   : > { %v760_v22 = vpop.f32.mrf.mxu0 }
 0x66e   : > { %v859_v23 = vpop.f32.mrf.mxu0 }
 0x66f   : > { %v863_v24 = vsel %vm551_vm6, %v859_v23, -inf }
 0x670   : > { %864 = vmax.xlane.f32.xlu1 %v863_v24 }
 0x676   : > { %v861_v25 = vpop.f32.mrf.mxu0 }
 0x689   : > { %875 = vrot.lane.b32.xlu1 %v1825_v37, %s1668_s15  ;;  %s1672_s15 = smov 104  }
 0x6ce   : > { %v835_v26 = vpop.f32.mrf.mxu2 }
 0x6cf   : > { %v1897_v27 = vadd.f32 %v835_v26, %v762_v21 }
 0x6d6   : > { %v837_v28 = vpop.f32.mrf.mxu2 }
 0x6de   : > { %v936_v29 = vpop.f32.mrf.mxu2 }
 0x6df   : > { %v940_v30 = vsel %vm551_vm6, %v936_v29, -inf }
 0x6e0   : > { %941 = vmax.xlane.f32.xlu2 %v940_v30 }
 0x6e3   : > { %v865_v20 = vpop.xlane.xlu1 %864 }
 0x6e4   : > { %v866_v31 = vsub.f32 %v859_v23, %v865_v20 }
 0x6e6   : > { %v867_v32 = vmul.f32 1.442695, %v866_v31  ;;  %v938_v33 = vpop.f32.mrf.mxu2 }
 0x6e8   : > { %1570 = vpow2.f32 %v867_v32 }
 0x6ee   : > { %v1571_v34 = vpop.eup %1570 }
 0x6ef   : > { %v869_v35 = vsel %vm551_vm6, %v1571_v34, 0.0 }
 0x6f0   : > { %870 = vadd.xlane.f32.xlu0 %v869_v35 }
 0x6f8   : > { %996 = vrot.lane.b32.xlu2 %v1825_v37, %s1669_s16  ;;  %s1673_s16 = smov 100  }
 0x6fb   : > { %v876_v36 = vpop.permute.xlu1 %875 }
 0x6fc   : > { %v881_v38 = vsel %vm569_vm8, %v876_v36, 0 }
 0x6fd   : > { %890 = vmatpush.bf16.msra.mxu1 %v881_v38 }
 0x701   : > { %987 = vmatpush.bf16.msrb.mxu1 %v978_v46 }
 0x704   : > { %1073 = vrot.lane.b32.xlu0 %v1825_v37, %s1670_s20  ;;  %s1674_s20 = smov 36  }
 0x753   : > { %v942_v41 = vpop.xlane.xlu2 %941 }
 0x754   : > { %v943_v43 = vsub.f32 %v936_v29, %v942_v41 }
 0x756   : > { %v944_v45 = vmul.f32 1.442695, %v943_v43 }
 0x758   : > { %1572 = vpow2.f32 %v944_v45  ;;  %v524_v45 = vld [vmem:[%s2042_s7 + $0xc] sm:$0x3] }
 0x759   : > { %v1055_v46 = vsel %vm650_vm7, %v524_v45, 0 }
 0x75b   : > { %v997_v47 = vpop.permute.xlu2 %996 }
 0x75c   : > { %v1002_v48 = vsel %vm531_vm5, %v997_v47, 0 }
 0x75d   : > { %1011 = vmatpush.bf16.xpose.msrb.mxu3 %v1002_v48 }
 0x75e   : > { %v1573_v49 = vpop.eup %1572 }
 0x75f   : > { %v946_v50 = vsel %vm551_vm6, %v1573_v49, 0.0 }
 0x760   : > { %947 = vadd.xlane.f32.xlu1 %v946_v50 }
 0x763   : > { %v871_v51 = vpop.xlane.xlu0 %870 }
 0x764   : > { %1574 = vrcp.f32 %v871_v51 }
 0x76a   : > { %v1575_v52 = vpop.eup %1574 }
 0x76b   : > { %v873_v53 = vmul.f32 %v1575_v52, %v1571_v34 }
 0x76d   : > { %v874_v54 = vpack.c.bf16 %v873_v53, %v873_v53 }
 0x76f   : > { %1411 = vmatmul.msk.bf16.vlgmr.msra.gmra.mxu1 %vm551_vm6, %v874_v54 }
 0x776   : > { %v1074_v55 = vpop.permute.xlu0 %1073 }
 0x777   : > { %v1079_v56 = vsel %vm531_vm5, %v1074_v55, 0 }
 0x778   : > { %1088 = vmatpush.bf16.xpose.msra.mxu1 %v1079_v56 }
 0x779   : > { %952 = vrot.lane.b32.xlu1 %v1825_v37, %s1671_s30 }
 0x781   : > { %994 = vrot.lane.b32.xlu1 %v1830_v42, %s1672_s15 }
 0x789   : > { %1071 = vrot.lane.b32.xlu1 %v1830_v42, %s1673_s16 }
 0x7d3   : > { %v948_v57 = vpop.xlane.xlu1 %947 }
 0x7d4   : > { %1576 = vrcp.f32 %v948_v57  ;;  %v1545_v57 = vld [vmem:[%s2043_s8] ss:$0 sm:$0xff] }
 0x7da   : > { %v1577_v58 = vpop.eup %1576 }
 0x7db   : > { %v950_v59 = vmul.f32 %v1577_v58, %v1573_v49 }
 0x7dd   : > { %v951_v1 = vpack.c.bf16 %v950_v59, %v950_v59 }
 0x7eb   : > { %v953_v61 = vpop.permute.xlu1 %952 }
 0x7ec   : > { %v892_v60 = vpop.f32.mrf.mxu1  ;;  %v958_v63 = vsel %vm569_vm8, %v953_v61, 0 }
 0x7ed   : > { %v896_v62 = vpack.c.bf16 %v892_v60, %v892_v60  ;;  %967 = vmatpush.bf16.msra.mxu0 %v958_v63 }
 0x7ef   : > { %1412 = vmatmul.msk.bf16.vlgmr.msra.gmra.mxu3 %vm531_vm5, %v896_v62 }
 0x7f0   : > { %1414 = vmatmul.msk.bf16.vlgmr.msra.gmra.mxu0 %vm551_vm6, %v951_v1 }
 0x7f1   : > { %1064 = vmatpush.bf16.msrb.mxu0 %v1055_v46 }
 0x7f3   : > { %v995_v3 = vpop.permute.xlu1 %994 }
 0x7f4   : > { %v894_v2 = vpop.f32.mrf.mxu1 }
 0x7fb   : > { %v1072_v10 = vpop.permute.xlu1 %1071 }
 0x7ff   : > { %1416 = vmatmul.msk.bf16.vlgmr.msrb.gmra.mxu3 %vm531_vm5, %v995_v3 }
 0x86d   : > { %v969_v42 = vpop.f32.mrf.mxu0 }
 0x86e   : > { %v973_v4 = vpack.c.bf16 %v969_v42, %v969_v42 }
 0x870   : > { %1415 = vmatmul.msk.bf16.vlgmr.msrb.gmra.mxu1 %vm531_vm5, %v973_v4  ;;  %v1469_v4 = vld [vmem:[%s2044_s9] sm:$0xff] }
 0x872   : > { %v912_v5 = vpop.f32.mrf.mxu3 }
 0x873   : > { %v916_v6 = vadd.f32 %v912_v5, %v1897_v27  ;;  %v1478_v5 = vld [vmem:[%s2046_s11 + $0x38] sm:$0xff] }
 0x874   : > { %1293 = vmatpush.bf16.msrb.mxu1 %v1478_v5 }
 0x875   : > { %v971_v7 = vpop.f32.mrf.mxu0 }
 0x87a   : > { %v914_v9 = vpop.f32.mrf.mxu3 }
 0x87b   : > { %v1477_v9 = vld [vmem:[%s2046_s11 + $0x30] sm:$0xff] }
 0x87c   : > { %1294 = vmatpush.bf16.msrb.mxu1 %v1477_v9 }
 0x880   : > { %1419 = vmatmul.msk.bf16.vlgmr.msra.gmra.mxu1 %vm531_vm5, %v1072_v10 }
 0x882   : > { %v1013_v11 = vpop.f32.mrf.mxu3 }
 0x883   : > { %v1017_v12 = vsel %vm551_vm6, %v1013_v11, -inf }
 0x884   : > { %1018 = vmax.xlane.f32.xlu0 %v1017_v12  ;;  %v1475_v12 = vld [vmem:[%s2046_s11 + $0x20] sm:$0xff] }
 0x88a   : > { %v1015_v13 = vpop.f32.mrf.mxu3 }
 0x898   : > { %1106 = vrot.lane.b32.xlu0 %v1825_v37, %s1674_s20  ;;  %s431_s20 = scalar_lea.vmem [#allocation2], %s1387_s23  ;;  %s1608_s23 = scalar_lea.hbm %s2048_s13, 16 }
 0x8ed   : > { %v989_v14 = vpop.f32.mrf.mxu1 }
 0x8ee   : > { %v993_v15 = vadd.f32 %v989_v14, %v916_v6 }
 0x8f5   : > { %v991_v16 = vpop.f32.mrf.mxu1 }
 0x8f7   : > { %v1019_v17 = vpop.xlane.xlu0 %1018 }
 0x8f8   : > { %v1020_v18 = vsub.f32 %v1013_v11, %v1019_v17  ;;  %v1476_v11 = vld [vmem:[%s2046_s11 + $0x28] sm:$0xff]  ;;  %v1473_v17 = vld [vmem:[%s2046_s11 + $0x10] sm:$0xff] }
 0x8f9   : > { %1295 = vmatpush.bf16.msrb.mxu1 %v1476_v11 }
 0x8fa   : > { %v1021_v19 = vmul.f32 1.442695, %v1020_v18 }
 0x8fc   : > { %1578 = vpow2.f32 %v1021_v19 }
 0x8fd   : > { %v1090_v21 = vpop.f32.mrf.mxu1  ;;  %1296 = vmatpush.bf16.msrb.mxu1 %v1475_v12 }
 0x8fe   : > { %v1094_v22 = vsel %vm551_vm6, %v1090_v21, -inf }
 0x8ff   : > { %1095 = vmax.xlane.f32.xlu1 %v1094_v22 }
 0x902   : > { %v1579_v23 = vpop.eup %1578 }
 0x903   : > { %v1023_v25 = vsel %vm551_vm6, %v1579_v23, 0.0 }
 0x905   : > { %v1092_v24 = vpop.f32.mrf.mxu1 }
 0x906   : > { %v1547_v24 = vld [vmem:[%s2039_s4] ss:$0 sm:$0xff] }
 0x907   : > { %1024 = vadd.xlane.f32.xlu1 %v1023_v25 }
 0x90a   : > { %v1107_v26 = vpop.permute.xlu0 %1106 }
 0x90b   : > { %v1112_v27 = vsel %vm569_vm8, %v1107_v26, 0 }
 0x90c   : > { %1121 = vmatpush.bf16.msra.mxu3 %v1112_v27 }
 0x972   : > { %v1096_v28 = vpop.xlane.xlu1 %1095 }
 0x973   : > { %v1097_v29 = vsub.f32 %v1090_v21, %v1096_v28  ;;  %v1546_v21 = vld [vmem:[%s2058_s3] ss:$0 sm:$0xff]  ;;  %v1472_v28 = vld [vmem:[%s2046_s11 + $0x8] sm:$0xff]  ;;  %s1602_s3 = sshra.s32 %s1324_s2, 4  ;;  %s1603_s3 = int_to_ptr.hbm [resolvable:$true] %s1602_s3 }
 0x974   : > { %s1604_s0 = scalar_lea.hbm %s1603_s3, 8  ;;  %p1609_p0 = scmp.lt.s32.totalorder %s1603_s3, %s2048_s13 }
 0x975   : > { %v1098_v30 = vmul.f32 1.442695, %v1097_v29  ;;  %v1471_v29 = vld [vmem:[%s2046_s11] sm:$0xff]  ;;  %p1605_p11 = scmp.ne.s32.totalorder %s1603_s3, %s1604_s0  ;;  %p1610_p1 = scmp.lt.s32.totalorder %s1608_s23, %s1604_s0 }
 0x977   : > { %1580 = vpow2.f32 %v1098_v30  ;;  %v1548_v30 = vld [vmem:[%s2045_s10] ss:$0 sm:$0xff]  ;;  %p1606_p12 = pnand %p1605_p11, %p1784_p5  ;;  %p1611_p2 = por %p1610_p1, %p1609_p0 }
 0x979   : > { %p1607_p13 = pneg %p1606_p12 }
 0x97a   : > { %v1025_v32 = vpop.xlane.xlu1 %1024 }
 0x97b   : > { %1582 = vrcp.f32 %v1025_v32  ;;  %p1612_p3 = pnand %p1611_p2, %p1607_p13 }
 0x97d   : > { %v1581_v20 = vpop.eup %1580 }
 0x97e   : > { %v1100_v31 = vsel %vm551_vm6, %v1581_v20, 0.0 }
 0x97f   : > { %1101 = vadd.xlane.f32.xlu2 %v1100_v31 }
 0x981   : > { %v1583_v34 = vpop.eup %1582 }
 0x982   : > { %v1027_v36 = vmul.f32 %v1583_v34, %v1579_v23 }
 0x984   : > { %v1028_v43 = vpack.c.bf16 %v1027_v36, %v1027_v36 }
 0x997   : > { %1029 = vrot.lane.b32.xlu2 %v1825_v37, %s1675_s21  ;;  %v525_v37 = vld [vmem:[%s2042_s7 + $0xe] sm:$0x3]  ;;  %s1321_s21 = sshll.u32 %s431_s20, 4  ;;  %s1322_s21 = int_to_ptr.vmem [resolvable:$true] %s1321_s21 }
 0x998   : > { %v1132_v44 = vsel %vm650_vm7, %v525_v37, 0 }
 0x9f2   : > { %v1102_v33 = vpop.xlane.xlu2 %1101 }
 0x9f3   : > { %1584 = vrcp.f32 %v1102_v33 }
 0x9f9   : > { %v1585_v35 = vpop.eup %1584 }
 0x9fa   : > { %v1104_v38 = vmul.f32 %v1585_v35, %v1581_v20  ;;  %v1030_v39 = vpop.permute.xlu2 %1029  ;;  %v1549_v35 = vld [vmem:[%s2047_s12] ss:$0 sm:$0xff] }
 0x9fb   : > { %v1035_v40 = vsel %vm569_vm8, %v1030_v39, 0 }
 0x9fc   : > { %v1105_v41 = vpack.c.bf16 %v1104_v38, %v1104_v38  ;;  %1044 = vmatpush.bf16.msrb.mxu2 %v1035_v40 }
 0x9fe   : > { %1420 = vmatmul.msk.bf16.vlgmr.msra.gmra.mxu3 %vm551_vm6, %v1105_v41 }
 0x9ff   : > { %1417 = vmatmul.msk.bf16.vlgmr.msrb.gmra.mxu2 %vm551_vm6, %v1028_v43 }
 0xa00   : > { %1141 = vmatpush.bf16.msra.mxu2 %v1132_v44 }
 0xa81   : > { %v1123_v47 = vpop.f32.mrf.mxu3 }
 0xa82   : > { %v1127_v48 = vpack.c.bf16 %v1123_v47, %v1123_v47  ;;  %v1046_v49 = vpop.f32.mrf.mxu2 }
 0xa83   : > { %v1050_v50 = vpack.c.bf16 %v1046_v49, %v1046_v49 }
 0xa84   : > { %1421 = vmatmul.msk.bf16.vlgmr.msra.gmra.mxu2 %vm531_vm5, %v1127_v48 }
 0xa85   : > { %1418 = vmatmul.msk.bf16.vlgmr.msrb.gmra.mxu0 %vm531_vm5, %v1050_v50 }
 0xa89   : > { %v1125_v51 = vpop.f32.mrf.mxu3 }
 0xa8a   : > { %v1048_v52 = vpop.f32.mrf.mxu2 }
 0xb02   : > { %v1066_v53 = vpop.f32.mrf.mxu0 }
 0xb03   : > { %v1070_v54 = vadd.f32 %v1066_v53, %v993_v15 }
 0xb07   : > { %v1143_v55 = vpop.f32.mrf.mxu2 }
 0xb08   : > { %v1147_v56 = vadd.f32 %v1143_v55, %v1070_v54 }
 0xb0a   : > { %v1148_v58 = vadd.f32 %v1147_v56, %v1799_v0  ;;  %v1068_v59 = vpop.f32.mrf.mxu0  ;;  %v1470_v0 = vld [vmem:[%s2044_s9 + $0x8] sm:$0xff] }
 0xb0b   : > { %1216 = vmatpush.bf16.msra.mxu0 %v1470_v0 }
 0xb0c   : > { %v1950_v60 = vadd.f32 %v1545_v57, %v1148_v58 }
 0xb0e   : > { %v1156_v61 = vsel %vm440_vm0, %v1950_v60, 0.0 }
 0xb0f   : > { %1157 = vadd.xlane.f32.xlu1 %v1156_v61  ;;  %v1145_v62 = vpop.f32.mrf.mxu2  ;;  %1217 = vmatpush.bf16.msra.mxu0 %v1469_v4 }
 0xb82   : > { %v1158_v63 = vpop.xlane.xlu1 %1157 }
 0xb83   : > { %v1159_v1 = vmul.f32 %v1158_v63, %v1803_v8 }
 0xb85   : > { %v1160_v2 = vsub.f32 %v1950_v60, %v1159_v1 }
 0xb87   : > { %v1161_v3 = vmul.f32 %v1160_v2, %v1160_v2 }
 0xb89   : > { %v1162_v42 = vsel %vm440_vm0, %v1161_v3, 0.0 }
 0xb8a   : > { %1163 = vadd.xlane.f32.xlu1 %v1162_v42 }
 0xbfd   : > { %v1164_v6 = vpop.xlane.xlu1 %1163 }
 0xbfe   : > { %v1165_v7 = vmul.f32 %v1164_v6, %v1803_v8  ;;  %v1474_v8 = vld [vmem:[%s2046_s11 + $0x18] sm:$0xff] }
 0xbff   : > { %1297 = vmatpush.bf16.msrb.mxu1 %v1474_v8 }
 0xc00   : > { %v1166_v10 = vadd.f32 1e-05, %v1165_v7 }
 0xc02   : > { %1586 = vrsqrt.f32 %v1166_v10  ;;  %vm1173_vm10 = vweird.f32 %v1166_v10 }
 0xc03   : > { %1298 = vmatpush.bf16.msrb.mxu1 %v1473_v17 }
 0xc07   : > { %1299 = vmatpush.bf16.msrb.mxu1 %v1472_v28 }
 0xc08   : > { %v1587_v13 = vpop.eup %1586 }
 0xc09   : > { %v1168_v14 = vmul.f32 %v1587_v13, %v1166_v10  ;;  %vm1174_vm9 = vweird.f32 %v1587_v13 }
 0xc0a   : > { %vm1175_vm11 = vmor %vm1173_vm10, %vm1174_vm9 }
 0xc0b   : > { %v1169_v15 = vmul.f32 %v1587_v13, %v1168_v14  ;;  %1300 = vmatpush.bf16.msrb.mxu1 %v1471_v29 }
 0xc0d   : > { %v1170_v16 = vmul.f32 0.5, %v1169_v15 }
 0xc0f   : > { %v1171_v18 = vsub.f32 1.5, %v1170_v16 }
 0xc11   : > { %v1172_v19 = vmul.f32 %v1587_v13, %v1171_v18 }
 0xc13   : > { %v1176_v22 = vsel %vm1175_vm11, %v1587_v13, %v1172_v19 }
 0xc14   : > { %v1177_v23 = vmul.f32 %v1176_v22, %v1160_v2 }
 0xc16   : > { %v1181_v25 = vmul.f32 %v1546_v21, %v1177_v23 }
 0xc18   : > { %v1185_v26 = vadd.f32 %v1547_v24, %v1181_v25 }
 0xc1a   : > { %v1186_v27 = vpack.c.bf16 %v1185_v26, %v1185_v26 }
 0xc1c   : > { %1430 = vmatmul.msk.bf16.vlgmr.msra.gmra.mxu0 %vm440_vm0, %v1186_v27 }
 0xc99   : > { %v1219_v20 = vpop.f32.mrf.mxu0 }
 0xc9a   : > { %v1220_v31 = vadd.f32 %v1548_v30, %v1219_v20 }
 0xc9c   : > { %v1223_v32 = vmax.f32 %v1220_v31, 0.0 }
 0xc9e   : > { %v1224_v33 = vpack.c.bf16 %v1223_v32, %v1223_v32 }
 0xca0   : > { %1301 = vmatmul.bf16.vlgmr.msrb.gmra.mxu1 %v1224_v33 }
 0xca1   : > { %v1221_v34 = vpop.f32.mrf.mxu0 }
 0xd1d   : > { %v1302_v36 = vpop.f32.mrf.mxu1 }
 0xd1e   : > { %v1303_v38 = vadd.f32 %v1549_v35, %v1302_v36 }
 0xd20   : > { %v1306_v39 = vadd.f32 %v1303_v38, %v1950_v60 }
 0xd22   : > { %1307 = vst.msk [vmem:[%s431_s20] sm:$0xff] %vm440_vm0, %v1306_v39 }
 0xd23   : > { %1615 = shalt.err (!%p1612_p3)
}
 0xd24   : > { %1479 = dma.vmem_to_hbm [thread:$0]  (%p1784_p5), %s1322_s21, 128, %s1324_s2, %s1309_s29  }
 0xd25   : > { %v1304_v40 = vpop.f32.mrf.mxu1 }
 0xd26 PF: > { %p1485_p4 = scmp.ge.s32.totalorder %s1650_s28, 2  ;;  %s1335_s22 = sand.u32 1, %s1638_s25  }
 0xd27   : > { %s1336_s16 = scalar_lea.sflag [#allocation3], %s1335_s22 }
 0xd28   : > { %p1482_p7 = pnand %p1485_p4, %p1788_p6 }
 0xd2a   : > { %p1483_p8 = pneg %p1482_p7 }
 0xd2c   : > { %1633 = dma.done.wait (%p1483_p8), %s1336_s16, 128  }
 0xd2d   : > { %1635 = vsyncadd (%p1483_p8), %s1336_s16, 4294967168  ;;  %p23_p9 = scmp.ge.s32.totalorder %s1771_s14, 4   ;;  %s2059_s25 = smov %s1642_s26 }
 0xd2e   : > { %s2060_s26 = smov %s1646_s27  ;;  %s2061_s27 = smov %s1782_s17 }
 0xd2f   : > { %s2062_s28 = smov %s1771_s14  ;;  %25 = sbr.rel (!%p23_p9) target bundleno = 8 (0x8), region = 107 }
 0xd34   :  { %1342 = vsyncpa [#allocation3], 1 }
 0xd35   :  { %1344 = vsyncpa [#allocation3 + $0x1], 1 }

</bundles_post_ra>
